<compile_context>
chip_gen: v5e
topology: v5e:2x2
jax: 0.10.0
libtpu: 0.0.40
codegen_flags: <defaults>
</compile_context>

<pallas_src>
import jax
import jax.numpy as jnp
from jax.experimental import pallas as pl
from jax.experimental.pallas import tpu as pltpu

# Logical dims from the PyTorch module.
DIMS = (784, 512, 256, 128, 64, 10)
H4_PAD = 128    # layer-4 output  64 -> 128 (lane-dense, numerically inert)
OUT_PAD = 128   # layer-5 output  10 -> 128 (lane-dense, unmasked vst)
MAX_TB = 1024   # max batch-tile rows


def _round_up(n, m):
    return ((n + m - 1) // m) * m


def mlp_kernel(x_ref,
               w1_ref, b1_ref,
               w2_ref, b2_ref,
               w3_ref, b3_ref,
               w4_ref, b4_ref,
               w5_ref, b5_ref,
               o_ref):
    """One batch tile: 5 fused matmuls, bf16 operands, f32 accumulation."""
    h = x_ref[...].astype(jnp.bfloat16)          # f32 [TB, 784] -> bf16 in VMEM
    h = jnp.maximum(
        jnp.dot(h, w1_ref[...], preferred_element_type=jnp.float32) + b1_ref[...],
        0.0).astype(jnp.bfloat16)
    h = jnp.maximum(
        jnp.dot(h, w2_ref[...], preferred_element_type=jnp.float32) + b2_ref[...],
        0.0).astype(jnp.bfloat16)
    h = jnp.maximum(
        jnp.dot(h, w3_ref[...], preferred_element_type=jnp.float32) + b3_ref[...],
        0.0).astype(jnp.bfloat16)
    h = jnp.maximum(
        jnp.dot(h, w4_ref[...], preferred_element_type=jnp.float32) + b4_ref[...],
        0.0).astype(jnp.bfloat16)                # padded cols 64:128 are exactly 0
    o_ref[...] = (
        jnp.dot(h, w5_ref[...], preferred_element_type=jnp.float32) + b5_ref[...]
    ).astype(o_ref.dtype)                        # padded cols 10:128 are exactly 0


def _pad2(a, rows, cols):
    r, c = a.shape
    return jnp.pad(a, ((0, rows - r), (0, cols - c)))


def prepare_params(params):
    """One-time cast/pad of raw f32 [in,out] params to the kernel's layout."""
    (w1, b1), (w2, b2), (w3, b3), (w4, b4), (w5, b5) = params
    w1p = w1.astype(jnp.bfloat16)                            # [784, 512], no K pad
    w2p = w2.astype(jnp.bfloat16)
    w3p = w3.astype(jnp.bfloat16)
    w4p = _pad2(w4, DIMS[3], H4_PAD).astype(jnp.bfloat16)
    w5p = _pad2(w5, H4_PAD, OUT_PAD).astype(jnp.bfloat16)
    b1p = b1.astype(jnp.float32)
    b2p = b2.astype(jnp.float32)
    b3p = b3.astype(jnp.float32)
    b4p = _pad2(b4, 1, H4_PAD).astype(jnp.float32)
    b5p = _pad2(b5, 1, OUT_PAD).astype(jnp.float32)
    return [w1p, b1p, w2p, b2p, w3p, b3p, w4p, b4p, w5p, b5p]


def _choose_tile(B):
    """Batch-tile rows: full-batch tile for small B; >=2 right-sized tiles for big B."""
    if B < 512:
        return B                                  # full-dim block, always legal
    n_tiles = max(2, pl.cdiv(B, MAX_TB))          # keep both v7x TCs busy
    return _round_up(pl.cdiv(B, n_tiles), 16)     # 16: bf16 sublane packing


def neural_net_forward(x, prepared_params):
    """x: [B, 784] float32 (or bfloat16). prepared_params: prepare_params(...)."""
    B = x.shape[0]
    TB = _choose_tile(B)

    in_specs = [pl.BlockSpec((TB, DIMS[0]), lambda i: (i, 0))]
    # Weights/biases: full-array blocks, constant index_map -> VMEM-resident
    # across all batch tiles (no re-DMA per grid step).
    for p in prepared_params:
        in_specs.append(pl.BlockSpec(p.shape, lambda i: (0, 0)))

    out = pl.pallas_call(
        mlp_kernel,
        out_shape=jax.ShapeDtypeStruct((B, OUT_PAD), jnp.bfloat16),
        grid=(pl.cdiv(B, TB),),
        in_specs=in_specs,
        out_specs=pl.BlockSpec((TB, OUT_PAD), lambda i: (i, 0)),
        compiler_params=pltpu.CompilerParams(
            dimension_semantics=("parallel",),    # shard batch tiles across TCs
            vmem_limit_bytes=32 << 20,            # safe on v7x (64 MiB physical)
        ),
    )(x, *prepared_params)

    # Tiny [:, :10] slice (+ f32 cast to match the PyTorch output dtype); fuse
    # into the consumer instead if the padded bf16 [B, 128] block is usable.
    return out[:, :DIMS[-1]].astype(jnp.float32)


def init_params(key):
    """Deterministic init mimicking nn.Linear defaults (uniform +-1/sqrt(fan_in)).

    Weights are stored [in, out] (transpose of PyTorch's [out, in]).
    """
    params = []
    for i in range(len(DIMS) - 1):
        fan_in, fan_out = DIMS[i], DIMS[i + 1]
        key, kw, kb = jax.random.split(key, 3)
        bound = 1.0 / (fan_in ** 0.5)
        w = jax.random.uniform(kw, (fan_in, fan_out), jnp.float32, -bound, bound)
        b = jax.random.uniform(kb, (1, fan_out), jnp.float32, -bound, bound)
        params.append((w, b))
    return params


def reference_forward(x, params):
    """Pure-JAX reference mirroring the kernel's bf16/f32 mixed precision."""
    h = x.astype(jnp.bfloat16)
    for i, (w, b) in enumerate(params):
        acc = jnp.dot(h, w.astype(jnp.bfloat16),
                      preferred_element_type=jnp.float32) + b
        if i < len(params) - 1:
            h = jnp.maximum(acc, 0.0).astype(jnp.bfloat16)
        else:
            h = acc.astype(jnp.bfloat16).astype(jnp.float32)   # mirror bf16 output
    return h


if __name__ == "__main__":
    key = jax.random.PRNGKey(0)
    key, kx = jax.random.split(key)
    batch = 8
    x = jax.random.normal(kx, (batch, DIMS[0]), jnp.float32)

    params = init_params(key)
    prepared = prepare_params(params)           # one-time layout conversion

    out = neural_net_forward(x, prepared)
    out = jax.block_until_ready(out)

    ref = reference_forward(x, params)
    assert out.shape == (batch, DIMS[-1])
    assert jnp.allclose(out, ref, atol=2e-2, rtol=2e-2), "mismatch vs JAX reference"

    print("KERNEL_OK")
</pallas_src>

<mosaic_0001>
module attributes {stable_mosaic.version = 11 : i64} {
  func.func @mlp_kernel(%arg0: i32, %arg1: memref<8x784xf32, #tpu.memory_space<vmem>>, %arg2: memref<784x512xbf16, #tpu.memory_space<vmem>>, %arg3: memref<1x512xf32, #tpu.memory_space<vmem>>, %arg4: memref<512x256xbf16, #tpu.memory_space<vmem>>, %arg5: memref<1x256xf32, #tpu.memory_space<vmem>>, %arg6: memref<256x128xbf16, #tpu.memory_space<vmem>>, %arg7: memref<1x128xf32, #tpu.memory_space<vmem>>, %arg8: memref<128x128xbf16, #tpu.memory_space<vmem>>, %arg9: memref<1x128xf32, #tpu.memory_space<vmem>>, %arg10: memref<128x128xbf16, #tpu.memory_space<vmem>>, %arg11: memref<1x128xf32, #tpu.memory_space<vmem>>, %arg12: memref<8x128xbf16, #tpu.memory_space<vmem>>) attributes {dimension_semantics = [#tpu.dimension_semantics<parallel>], iteration_bounds = array<i64: 1>, scalar_prefetch = 0 : i64, scratch_operands = 0 : i64, tpu.core_type = #tpu.core_type<tc>, window_params = [{transform_indices = @transform_0, window_bounds = array<i64: 8, 784>}, {pipeline_mode = #tpu.pipeline_mode<synchronous>, transform_indices = @transform_1, window_bounds = array<i64: 784, 512>}, {pipeline_mode = #tpu.pipeline_mode<synchronous>, transform_indices = @transform_2, window_bounds = array<i64: 1, 512>}, {pipeline_mode = #tpu.pipeline_mode<synchronous>, transform_indices = @transform_3, window_bounds = array<i64: 512, 256>}, {pipeline_mode = #tpu.pipeline_mode<synchronous>, transform_indices = @transform_4, window_bounds = array<i64: 1, 256>}, {pipeline_mode = #tpu.pipeline_mode<synchronous>, transform_indices = @transform_5, window_bounds = array<i64: 256, 128>}, {pipeline_mode = #tpu.pipeline_mode<synchronous>, transform_indices = @transform_6, window_bounds = array<i64: 1, 128>}, {pipeline_mode = #tpu.pipeline_mode<synchronous>, transform_indices = @transform_7, window_bounds = array<i64: 128, 128>}, {pipeline_mode = #tpu.pipeline_mode<synchronous>, transform_indices = @transform_8, window_bounds = array<i64: 1, 128>}, {pipeline_mode = #tpu.pipeline_mode<synchronous>, transform_indices = @transform_9, window_bounds = array<i64: 128, 128>}, {pipeline_mode = #tpu.pipeline_mode<synchronous>, transform_indices = @transform_10, window_bounds = array<i64: 1, 128>}, {transform_indices = @transform_11, window_bounds = array<i64: 8, 128>}]} {
    %c0 = arith.constant 0 : index
    %c0_0 = arith.constant 0 : index
    %0 = vector.load %arg1[%c0, %c0_0] : memref<8x784xf32, #tpu.memory_space<vmem>>, vector<8x784xf32>
    %1 = arith.truncf %0 : vector<8x784xf32> to vector<8x784xbf16>
    %c0_1 = arith.constant 0 : index
    %c0_2 = arith.constant 0 : index
    %2 = vector.load %arg2[%c0_1, %c0_2] : memref<784x512xbf16, #tpu.memory_space<vmem>>, vector<784x512xbf16>
    %cst = arith.constant dense<0.000000e+00> : vector<8x512xf32>
    %3 = tpu.matmul %1, %2, %cst {dimension_numbers = #tpu.dot_dimension_numbers<[1], [0], [0], [1], [0, 0, 1, 1], [], []>} : vector<8x784xbf16>, vector<784x512xbf16>, vector<8x512xf32> -> vector<8x512xf32>
    %c0_3 = arith.constant 0 : index
    %c0_4 = arith.constant 0 : index
    %4 = vector.load %arg3[%c0_3, %c0_4] : memref<1x512xf32, #tpu.memory_space<vmem>>, vector<1x512xf32>
    %5 = vector.broadcast %4 : vector<1x512xf32> to vector<8x512xf32>
    %6 = arith.addf %3, %5 : vector<8x512xf32>
    %cst_5 = arith.constant 0.000000e+00 : f32
    %7 = vector.broadcast %cst_5 : f32 to vector<8x512xf32>
    %8 = arith.maximumf %6, %7 : vector<8x512xf32>
    %9 = arith.truncf %8 : vector<8x512xf32> to vector<8x512xbf16>
    %c0_6 = arith.constant 0 : index
    %c0_7 = arith.constant 0 : index
    %10 = vector.load %arg4[%c0_6, %c0_7] : memref<512x256xbf16, #tpu.memory_space<vmem>>, vector<512x256xbf16>
    %cst_8 = arith.constant dense<0.000000e+00> : vector<8x256xf32>
    %11 = tpu.matmul %9, %10, %cst_8 {dimension_numbers = #tpu.dot_dimension_numbers<[1], [0], [0], [1], [0, 0, 1, 1], [], []>} : vector<8x512xbf16>, vector<512x256xbf16>, vector<8x256xf32> -> vector<8x256xf32>
    %c0_9 = arith.constant 0 : index
    %c0_10 = arith.constant 0 : index
    %12 = vector.load %arg5[%c0_9, %c0_10] : memref<1x256xf32, #tpu.memory_space<vmem>>, vector<1x256xf32>
    %13 = vector.broadcast %12 : vector<1x256xf32> to vector<8x256xf32>
    %14 = arith.addf %11, %13 : vector<8x256xf32>
    %cst_11 = arith.constant 0.000000e+00 : f32
    %15 = vector.broadcast %cst_11 : f32 to vector<8x256xf32>
    %16 = arith.maximumf %14, %15 : vector<8x256xf32>
    %17 = arith.truncf %16 : vector<8x256xf32> to vector<8x256xbf16>
    %c0_12 = arith.constant 0 : index
    %c0_13 = arith.constant 0 : index
    %18 = vector.load %arg6[%c0_12, %c0_13] : memref<256x128xbf16, #tpu.memory_space<vmem>>, vector<256x128xbf16>
    %cst_14 = arith.constant dense<0.000000e+00> : vector<8x128xf32>
    %19 = tpu.matmul %17, %18, %cst_14 {dimension_numbers = #tpu.dot_dimension_numbers<[1], [0], [0], [1], [0, 0, 1, 1], [], []>} : vector<8x256xbf16>, vector<256x128xbf16>, vector<8x128xf32> -> vector<8x128xf32>
    %c0_15 = arith.constant 0 : index
    %c0_16 = arith.constant 0 : index
    %20 = vector.load %arg7[%c0_15, %c0_16] : memref<1x128xf32, #tpu.memory_space<vmem>>, vector<1x128xf32>
    %21 = vector.broadcast %20 : vector<1x128xf32> to vector<8x128xf32>
    %22 = arith.addf %19, %21 : vector<8x128xf32>
    %cst_17 = arith.constant 0.000000e+00 : f32
    %23 = vector.broadcast %cst_17 : f32 to vector<8x128xf32>
    %24 = arith.maximumf %22, %23 : vector<8x128xf32>
    %25 = arith.truncf %24 : vector<8x128xf32> to vector<8x128xbf16>
    %c0_18 = arith.constant 0 : index
    %c0_19 = arith.constant 0 : index
    %26 = vector.load %arg8[%c0_18, %c0_19] : memref<128x128xbf16, #tpu.memory_space<vmem>>, vector<128x128xbf16>
    %cst_20 = arith.constant dense<0.000000e+00> : vector<8x128xf32>
    %27 = tpu.matmul %25, %26, %cst_20 {dimension_numbers = #tpu.dot_dimension_numbers<[1], [0], [0], [1], [0, 0, 1, 1], [], []>} : vector<8x128xbf16>, vector<128x128xbf16>, vector<8x128xf32> -> vector<8x128xf32>
    %c0_21 = arith.constant 0 : index
    %c0_22 = arith.constant 0 : index
    %28 = vector.load %arg9[%c0_21, %c0_22] : memref<1x128xf32, #tpu.memory_space<vmem>>, vector<1x128xf32>
    %29 = vector.broadcast %28 : vector<1x128xf32> to vector<8x128xf32>
    %30 = arith.addf %27, %29 : vector<8x128xf32>
    %cst_23 = arith.constant 0.000000e+00 : f32
    %31 = vector.broadcast %cst_23 : f32 to vector<8x128xf32>
    %32 = arith.maximumf %30, %31 : vector<8x128xf32>
    %33 = arith.truncf %32 : vector<8x128xf32> to vector<8x128xbf16>
    %c0_24 = arith.constant 0 : index
    %c0_25 = arith.constant 0 : index
    %34 = vector.load %arg10[%c0_24, %c0_25] : memref<128x128xbf16, #tpu.memory_space<vmem>>, vector<128x128xbf16>
    %cst_26 = arith.constant dense<0.000000e+00> : vector<8x128xf32>
    %35 = tpu.matmul %33, %34, %cst_26 {dimension_numbers = #tpu.dot_dimension_numbers<[1], [0], [0], [1], [0, 0, 1, 1], [], []>} : vector<8x128xbf16>, vector<128x128xbf16>, vector<8x128xf32> -> vector<8x128xf32>
    %c0_27 = arith.constant 0 : index
    %c0_28 = arith.constant 0 : index
    %36 = vector.load %arg11[%c0_27, %c0_28] : memref<1x128xf32, #tpu.memory_space<vmem>>, vector<1x128xf32>
    %37 = vector.broadcast %36 : vector<1x128xf32> to vector<8x128xf32>
    %38 = arith.addf %35, %37 : vector<8x128xf32>
    %39 = arith.truncf %38 : vector<8x128xf32> to vector<8x128xbf16>
    %c0_29 = arith.constant 0 : index
    %c0_30 = arith.constant 0 : index
    %40 = vector.load %arg12[%c0_29, %c0_30] : memref<8x128xbf16, #tpu.memory_space<vmem>>, vector<8x128xbf16>
    tpu.vector_store %arg12[%c0_29, %c0_30], %39 {strides = array<i32>} : memref<8x128xbf16, #tpu.memory_space<vmem>>, vector<8x128xbf16>,
    return
  }
  func.func @transform_0(%arg0: i32) -> (i32, i32) {
    %c0_i32 = arith.constant 0 : i32
    %c0_i32_0 = arith.constant 0 : i32
    return %arg0, %c0_i32 : i32, i32
  }
  func.func @transform_1(%arg0: i32) -> (i32, i32) {
    %c0_i32 = arith.constant 0 : i32
    %c0_i32_0 = arith.constant 0 : i32
    %c0_i32_1 = arith.constant 0 : i32
    return %c0_i32, %c0_i32_0 : i32, i32
  }
  func.func @transform_2(%arg0: i32) -> (i32, i32) {
    %c0_i32 = arith.constant 0 : i32
    %c0_i32_0 = arith.constant 0 : i32
    %c0_i32_1 = arith.constant 0 : i32
    return %c0_i32, %c0_i32_0 : i32, i32
  }
  func.func @transform_3(%arg0: i32) -> (i32, i32) {
    %c0_i32 = arith.constant 0 : i32
    %c0_i32_0 = arith.constant 0 : i32
    %c0_i32_1 = arith.constant 0 : i32
    return %c0_i32, %c0_i32_0 : i32, i32
  }
  func.func @transform_4(%arg0: i32) -> (i32, i32) {
    %c0_i32 = arith.constant 0 : i32
    %c0_i32_0 = arith.constant 0 : i32
    %c0_i32_1 = arith.constant 0 : i32
    return %c0_i32, %c0_i32_0 : i32, i32
  }
  func.func @transform_5(%arg0: i32) -> (i32, i32) {
    %c0_i32 = arith.constant 0 : i32
    %c0_i32_0 = arith.constant 0 : i32
    %c0_i32_1 = arith.constant 0 : i32
    return %c0_i32, %c0_i32_0 : i32, i32
  }
  func.func @transform_6(%arg0: i32) -> (i32, i32) {
    %c0_i32 = arith.constant 0 : i32
    %c0_i32_0 = arith.constant 0 : i32
    %c0_i32_1 = arith.constant 0 : i32
    return %c0_i32, %c0_i32_0 : i32, i32
  }
  func.func @transform_7(%arg0: i32) -> (i32, i32) {
    %c0_i32 = arith.constant 0 : i32
    %c0_i32_0 = arith.constant 0 : i32
    %c0_i32_1 = arith.constant 0 : i32
    return %c0_i32, %c0_i32_0 : i32, i32
  }
  func.func @transform_8(%arg0: i32) -> (i32, i32) {
    %c0_i32 = arith.constant 0 : i32
    %c0_i32_0 = arith.constant 0 : i32
    %c0_i32_1 = arith.constant 0 : i32
    return %c0_i32, %c0_i32_0 : i32, i32
  }
  func.func @transform_9(%arg0: i32) -> (i32, i32) {
    %c0_i32 = arith.constant 0 : i32
    %c0_i32_0 = arith.constant 0 : i32
    %c0_i32_1 = arith.constant 0 : i32
    return %c0_i32, %c0_i32_0 : i32, i32
  }
  func.func @transform_10(%arg0: i32) -> (i32, i32) {
    %c0_i32 = arith.constant 0 : i32
    %c0_i32_0 = arith.constant 0 : i32
    %c0_i32_1 = arith.constant 0 : i32
    return %c0_i32, %c0_i32_0 : i32, i32
  }
  func.func @transform_11(%arg0: i32) -> (i32, i32) {
    %c0_i32 = arith.constant 0 : i32
    %c0_i32_0 = arith.constant 0 : i32
    return %arg0, %c0_i32 : i32, i32
  }
}

</mosaic_0001>

<bundles_post_ra>
// kernel: tpu_custom_call.1
= control target key start
LH: loop header
LB: loop body
LE: loop exit
PB: predicated region body
PF: predicated region fallthrough
CT: control target
= control target key end

     0   :  { %16 = vsyncpa [#allocation3], 0  ;;  %s4435_s0 = inlined_call_operand.hbm [shape: f32[8,784], index: 0, kind: input, shape index: {}]   ;;  %s4436_s1 = inlined_call_operand.hbm [shape: bf16[784,512], index: 1, kind: input, shape index: {}]   ;;  %s4437_s2 = inlined_call_operand.hbm [shape: f32[1,512], index: 2, kind: input, shape index: {}]   ;;  %s4438_s3 = inlined_call_operand.hbm [shape: bf16[512,256], index: 3, kind: input, shape index: {}]   ;;  %s4439_s4 = inlined_call_operand.vmem [shape: f32[1,256], index: 4, kind: input, shape index: {}]   ;;  %s4440_s5 = inlined_call_operand.hbm [shape: bf16[256,128], index: 5, kind: input, shape index: {}]   ;;  %s4441_s6 = inlined_call_operand.vmem [shape: f32[1,128], index: 6, kind: input, shape index: {}]   ;;  %s4442_s7 = inlined_call_operand.hbm [shape: bf16[128,128], index: 7, kind: input, shape index: {}]   ;;  %s4443_s8 = inlined_call_operand.vmem [shape: f32[1,128], index: 8, kind: input, shape index: {}]   ;;  %s4444_s9 = inlined_call_operand.hbm [shape: bf16[128,128], index: 9, kind: input, shape index: {}]   ;;  %s4445_s10 = inlined_call_operand.vmem [shape: f32[1,128], index: 10, kind: input, shape index: {}]   ;;  %s4446_s11 = inlined_call_operand.hbm [shape: bf16[8,128], index: 11, kind: output, shape index: {}]  }
   0x1   :  { %17 = vsyncpa [#allocation6], 0 }
   0x2   :  { %18 = vsyncpa [#allocation9], 0 }
   0x3   :  { %19 = vsyncpa [#allocation12], 0  ;;  %s36_s19 = sshll.u32 %s4436_s1, 4  ;;  %s37_s19 = int_to_ptr.hbm [resolvable:$true] %s36_s19 }
   0x4   :  { %20 = vsyncpa [#allocation4], 0  ;;  %s4248_s20 = smov [#allocation5]   ;;  %s60_s24 = sshll.u32 %s4438_s3, 4  ;;  %s61_s24 = int_to_ptr.hbm [resolvable:$true] %s60_s24 }
   0x5   :  { %s38_s21 = sshll.u32 %s4248_s20, 4  ;;  %s4249_s25 = smov 256   ;;  %s39_s21 = int_to_ptr.vmem [resolvable:$true] %s38_s21 }
   0x6   :  { %s4250_s26 = smov 16   ;;  %s4251_s27 = smov [#allocation8]  }
   0x7   :  { %44 = dma.hbm_to_vmem [thread:$0]  %s37_s19, 25088, %s39_s21, [#allocation6], %s4249_s25, %s4249_s25, %s4250_s26  }
   0x8   :  { %s62_s28 = sshll.u32 %s4251_s27, 4  ;;  %s4252_s29 = smov 128   ;;  %s63_s28 = int_to_ptr.vmem [resolvable:$true] %s62_s28 }
   0x9   :  { %s4253_s30 = smov 8   ;;  %s90_s13 = sshll.u32 %s4442_s7, 4  ;;  %s91_s13 = int_to_ptr.hbm [resolvable:$true] %s90_s13 }
   0xa   :  { %68 = dma.hbm_to_vmem [thread:$0]  %s61_s24, 8192, %s63_s28, [#allocation9], %s4252_s29, %s4252_s29, %s4253_s30  }
   0xb   :  { %s4254_s14 = smov [#allocation11]   ;;  %s26_s17 = sshll.u32 %s4435_s0, 4  ;;  %s27_s17 = int_to_ptr.hbm [resolvable:$true] %s26_s17 }
   0xc   :  { %s92_s15 = sshll.u32 %s4254_s14, 4  ;;  %s4255_s18 = smov 64   ;;  %s93_s15 = int_to_ptr.vmem [resolvable:$true] %s92_s15 }
   0xd   :  { %s4256_s19 = smov 4   ;;  %s4257_s20 = smov [#allocation2]  }
   0xe   :  { %98 = dma.hbm_to_vmem [thread:$0]  %s91_s13, 1024, %s93_s15, [#allocation12], %s4255_s18, %s4255_s18, %s4256_s19  }
   0xf   :  { %s28_s21 = sshll.u32 %s4257_s20, 4  ;;  %s50_s24 = sshll.u32 %s4437_s2, 4  ;;  %s29_s21 = int_to_ptr.vmem [resolvable:$true] %s28_s21  ;;  %s51_s24 = int_to_ptr.hbm [resolvable:$true] %s50_s24 }
  0x10   :  { %31 = dma.hbm_to_vmem [thread:$0]  %s27_s17, 896, %s29_s21, [#allocation3]  }
  0x11   :  { %s75_s26 = sshll.u32 %s4440_s5, 4  ;;  %s4258_s27 = smov [#allocation7]   ;;  %s76_s26 = int_to_ptr.hbm [resolvable:$true] %s75_s26 }
  0x12   :  { %s52_s28 = sshll.u32 %s4258_s27, 4  ;;  %s4259_s0 = smov [#allocation10]   ;;  %s53_s28 = int_to_ptr.vmem [resolvable:$true] %s52_s28 }
  0x13   :  { %55 = dma.hbm_to_vmem [thread:$0]  %s51_s24, 64, %s53_s28, [#allocation6]  }
  0x14   :  { %s77_s29 = sshll.u32 %s4259_s0, 4  ;;  %s105_s12 = sshll.u32 %s4444_s9, 4  ;;  %s78_s29 = int_to_ptr.vmem [resolvable:$true] %s77_s29  ;;  %s106_s12 = int_to_ptr.hbm [resolvable:$true] %s105_s12 }
  0x15   :  { %83 = dma.hbm_to_vmem [thread:$0]  %s76_s26, 2048, %s78_s29, [#allocation9], %s4255_s18, %s4255_s18, %s4256_s19  }
  0x16   :  { %s4260_s2 = smov [#allocation13]  }
  0x17   :  { %s107_s13 = sshll.u32 %s4260_s2, 4  ;;  %s108_s13 = int_to_ptr.vmem [resolvable:$true] %s107_s13 }
  0x18   :  { %113 = dma.hbm_to_vmem [thread:$0]  %s106_s12, 1024, %s108_s13, [#allocation12], %s4255_s18, %s4255_s18, %s4256_s19  }
  0x19   :  { %4238 = dma.done.wait [#allocation3], 896  }
  0x1a   :  { %4239 = vsyncadd [#allocation3], 4294966400 }
  0x1b   :  { %4240 = dma.done.wait [#allocation6], 25152  }
  0x1c   :  { %4241 = vsyncadd [#allocation6], 4294942144 }
  0x1d   :  { %4242 = dma.done.wait [#allocation9], 10240  }
  0x1e   :  { %4243 = vsyncadd [#allocation9], 4294957056 }
  0x1f   :  { %4244 = dma.done.wait [#allocation12], 2048  }
  0x20   :  { %4245 = vsyncadd [#allocation12], 4294965248  ;;  %v2679_v0 = vld [vmem:[#allocation5 + $0xe0] sm:$0xf]  ;;  %v3767_v1 = vld [vmem:[#allocation5 + $0xec] sm:$0xf0] }
  0x21   :  { %v2807_v2 = vld [vmem:[#allocation5 + $0x1e0] sm:$0xf]  ;;  %v2680_v3 = vor.u32 %v3767_v1, %v2679_v0  ;;  %v3799_v4 = vld [vmem:[#allocation5 + $0x1ec] sm:$0xf0]  ;;  %vm1345_vm0 = vcmask 130048   ;;  %s4261_s17 = smov [#allocation14]  }
  0x22   :  { %v2935_v5 = vld [vmem:[#allocation5 + $0x2e0] sm:$0xf]  ;;  %v3831_v6 = vld [vmem:[#allocation5 + $0x2ec] sm:$0xf0]  ;;  %v2808_v7 = vor.u32 %v3799_v4, %v2807_v2  ;;  %s2550_s18 = sshll.u32 %s4261_s17, 4  ;;  %s2552_s21 = sshll.u32 %s4446_s11, 4  ;;  %s2551_s18 = int_to_ptr.vmem [resolvable:$true] %s2550_s18  ;;  %s2553_s21 = int_to_ptr.hbm [resolvable:$true] %s2552_s21 }
  0x23   :  { %v2936_v8 = vor.u32 %v3831_v6, %v2935_v5  ;;  %v3063_v9 = vld [vmem:[#allocation5 + $0x3e0] sm:$0xf]  ;;  %v3863_v10 = vld [vmem:[#allocation5 + $0x3ec] sm:$0xf0]  ;;  %1349 = vmatpush.bf16.msra.mxu0 %v2680_v3 }
  0x24   :  { %v2663_v11 = vld [vmem:[#allocation5 + $0xc0] sm:$0xf]  ;;  %v3064_v12 = vor.u32 %v3863_v10, %v3063_v9  ;;  %v3763_v13 = vld [vmem:[#allocation5 + $0xcc] sm:$0xf0]  ;;  %1362 = vmatpush.bf16.msra.mxu1 %v2808_v7 }
  0x25   :  { %v2791_v14 = vld [vmem:[#allocation5 + $0x1c0] sm:$0xf]  ;;  %v3795_v15 = vld [vmem:[#allocation5 + $0x1cc] sm:$0xf0]  ;;  %1375 = vmatpush.bf16.msra.mxu2 %v2936_v8  ;;  %v2664_v16 = vor.u32 %v3763_v13, %v2663_v11 }
  0x26   :  { %v2792_v17 = vor.u32 %v3795_v15, %v2791_v14  ;;  %v2919_v18 = vld [vmem:[#allocation5 + $0x2c0] sm:$0xf]  ;;  %v3827_v19 = vld [vmem:[#allocation5 + $0x2cc] sm:$0xf0]  ;;  %1388 = vmatpush.bf16.msra.mxu3 %v3064_v12 }
  0x27   :  { %v3047_v20 = vld [vmem:[#allocation5 + $0x3c0] sm:$0xf]  ;;  %v2920_v21 = vor.u32 %v3827_v19, %v2919_v18  ;;  %v3859_v22 = vld [vmem:[#allocation5 + $0x3cc] sm:$0xf0]  ;;  %1350 = vmatpush.bf16.msra.mxu0 %v2664_v16 }
  0x28   :  { %v2647_v23 = vld [vmem:[#allocation5 + $0xa0] sm:$0xf]  ;;  %v3759_v24 = vld [vmem:[#allocation5 + $0xac] sm:$0xf0]  ;;  %v3048_v25 = vor.u32 %v3859_v22, %v3047_v20  ;;  %1363 = vmatpush.bf16.msra.mxu1 %v2792_v17 }
  0x29   :  { %v2775_v26 = vld [vmem:[#allocation5 + $0x1a0] sm:$0xf]  ;;  %v3791_v27 = vld [vmem:[#allocation5 + $0x1ac] sm:$0xf0]  ;;  %v2648_v29 = vor.u32 %v3759_v24, %v2647_v23  ;;  %1376 = vmatpush.bf16.msra.mxu2 %v2920_v21 }
  0x2a   :  { %v2903_v28 = vld [vmem:[#allocation5 + $0x2a0] sm:$0xf]  ;;  %v3823_v30 = vld [vmem:[#allocation5 + $0x2ac] sm:$0xf0]  ;;  %v2776_v33 = vor.u32 %v3791_v27, %v2775_v26  ;;  %1389 = vmatpush.bf16.msra.mxu3 %v3048_v25 }
  0x2b   :  { %v3031_v31 = vld [vmem:[#allocation5 + $0x3a0] sm:$0xf]  ;;  %v3855_v32 = vld [vmem:[#allocation5 + $0x3ac] sm:$0xf0]  ;;  %v2904_v34 = vor.u32 %v3823_v30, %v2903_v28  ;;  %1351 = vmatpush.bf16.msra.mxu0 %v2648_v29 }
  0x2c   :  { %v2631_v35 = vld [vmem:[#allocation5 + $0x80] sm:$0xf]  ;;  %v3755_v36 = vld [vmem:[#allocation5 + $0x8c] sm:$0xf0]  ;;  %v3032_v38 = vor.u32 %v3855_v32, %v3031_v31  ;;  %1364 = vmatpush.bf16.msra.mxu1 %v2776_v33  ;;  %v3765_v33 = vld [vmem:[#allocation5 + $0xe4] sm:$0xf] }
  0x2d   :  { %v2759_v37 = vld [vmem:[#allocation5 + $0x180] sm:$0xf]  ;;  %v3787_v39 = vld [vmem:[#allocation5 + $0x18c] sm:$0xf0]  ;;  %v2632_v44 = vor.u32 %v3755_v36, %v2631_v35  ;;  %1377 = vmatpush.bf16.msra.mxu2 %v2904_v34  ;;  %v2681_v34 = vld [vmem:[#allocation5 + $0xf0] sm:$0xf0] }
  0x2e   :  { %v2887_v40 = vld [vmem:[#allocation5 + $0x280] sm:$0xf]  ;;  %v3819_v41 = vld [vmem:[#allocation5 + $0x28c] sm:$0xf0]  ;;  %v2760_v45 = vor.u32 %v3787_v39, %v2759_v37  ;;  %1390 = vmatpush.bf16.msra.mxu3 %v3032_v38  ;;  %v147_v35 = vld [vmem:[#allocation2 + $0x10] sm:$0xff] }
  0x2f   :  { %v3015_v42 = vld [vmem:[#allocation5 + $0x380] sm:$0xf]  ;;  %v3851_v43 = vld [vmem:[#allocation5 + $0x38c] sm:$0xf0]  ;;  %v2888_v46 = vor.u32 %v3819_v41, %v2887_v40  ;;  %1352 = vmatpush.bf16.msra.mxu0 %v2632_v44  ;;  %v145_v40 = vld [vmem:[#allocation2] sm:$0xff] }
  0x30   :  { %v2615_v47 = vld [vmem:[#allocation5 + $0x60] sm:$0xf]  ;;  %v3751_v48 = vld [vmem:[#allocation5 + $0x6c] sm:$0xf0]  ;;  %v3016_v50 = vor.u32 %v3851_v43, %v3015_v42  ;;  %1365 = vmatpush.bf16.msra.mxu1 %v2760_v45  ;;  %v3797_v43 = vld [vmem:[#allocation5 + $0x1e4] sm:$0xf] }
  0x31   :  { %v2743_v49 = vld [vmem:[#allocation5 + $0x160] sm:$0xf]  ;;  %v3783_v51 = vld [vmem:[#allocation5 + $0x16c] sm:$0xf0]  ;;  %v2616_v56 = vor.u32 %v3751_v48, %v2615_v47  ;;  %1378 = vmatpush.bf16.msra.mxu2 %v2888_v46  ;;  %v2809_v44 = vld [vmem:[#allocation5 + $0x1f0] sm:$0xf0]  ;;  %v2684_v47 = vor.u32 %v3765_v33, %v2681_v34 }
  0x32   :  { %v2871_v52 = vld [vmem:[#allocation5 + $0x260] sm:$0xf]  ;;  %v3815_v53 = vld [vmem:[#allocation5 + $0x26c] sm:$0xf0]  ;;  %v2744_v57 = vor.u32 %v3783_v51, %v2743_v49  ;;  %1391 = vmatpush.bf16.msra.mxu3 %v3016_v50  ;;  %v4343_v51 = vpack.c.bf16 %v147_v35, %v147_v35  ;;  %v3781_v35 = vld [vmem:[#allocation5 + $0x164] sm:$0xf] }
  0x33   :  { %v2999_v54 = vld [vmem:[#allocation5 + $0x360] sm:$0xf]  ;;  %v3847_v55 = vld [vmem:[#allocation5 + $0x36c] sm:$0xf0]  ;;  %v2872_v58 = vor.u32 %v3815_v53, %v2871_v52  ;;  %1353 = vmatpush.bf16.msra.mxu0 %v2616_v56  ;;  %v3761_v53 = vld [vmem:[#allocation5 + $0xc4] sm:$0xf] }
  0x34   :  { %v2599_v59 = vld [vmem:[#allocation5 + $0x40] sm:$0xf]  ;;  %v3747_v60 = vld [vmem:[#allocation5 + $0x4c] sm:$0xf0]  ;;  %v3000_v62 = vor.u32 %v3847_v55, %v2999_v54  ;;  %1366 = vmatpush.bf16.msra.mxu1 %v2744_v57  ;;  %v2665_v54 = vld [vmem:[#allocation5 + $0xd0] sm:$0xf0]  ;;  %v4345_v55 = vpack.c.bf16 %v145_v40, %v145_v40 }
  0x35   :  { %v2727_v61 = vld [vmem:[#allocation5 + $0x140] sm:$0xf]  ;;  %v3779_v63 = vld [vmem:[#allocation5 + $0x14c] sm:$0xf0]  ;;  %v2600_v4 = vor.u32 %v3747_v60, %v2599_v59  ;;  %1379 = vmatpush.bf16.msra.mxu2 %v2872_v58  ;;  %v2812_v59 = vor.u32 %v3797_v43, %v2809_v44  ;;  %v3745_v43 = vld [vmem:[#allocation5 + $0x44] sm:$0xf] }
  0x36   :  { %v2855_v0 = vld [vmem:[#allocation5 + $0x240] sm:$0xf]  ;;  %v3811_v1 = vld [vmem:[#allocation5 + $0x24c] sm:$0xf0]  ;;  %v2728_v5 = vor.u32 %v3779_v63, %v2727_v61  ;;  %1392 = vmatpush.bf16.msra.mxu3 %v3000_v62  ;;  %v3793_v61 = vld [vmem:[#allocation5 + $0x1c4] sm:$0xf] }
  0x37   :  { %v2983_v2 = vld [vmem:[#allocation5 + $0x340] sm:$0xf]  ;;  %v3843_v3 = vld [vmem:[#allocation5 + $0x34c] sm:$0xf0]  ;;  %v2856_v6 = vor.u32 %v3811_v1, %v2855_v0  ;;  %1354 = vmatpush.bf16.msra.mxu0 %v2600_v4  ;;  %v2793_v62 = vld [vmem:[#allocation5 + $0x1d0] sm:$0xf0]  ;;  %v2668_v0 = vor.u32 %v3761_v53, %v2665_v54 }
  0x38   :  { %v2583_v7 = vld [vmem:[#allocation5 + $0x20] sm:$0xf]  ;;  %v3743_v8 = vld [vmem:[#allocation5 + $0x2c] sm:$0xf0]  ;;  %v2984_v10 = vor.u32 %v3843_v3, %v2983_v2  ;;  %1367 = vmatpush.bf16.msra.mxu1 %v2728_v5  ;;  %v3757_v5 = vld [vmem:[#allocation5 + $0xa4] sm:$0xf] }
  0x39   :  { %v2711_v9 = vld [vmem:[#allocation5 + $0x120] sm:$0xf]  ;;  %v3775_v11 = vld [vmem:[#allocation5 + $0x12c] sm:$0xf0]  ;;  %v2584_v16 = vor.u32 %v3743_v8, %v2583_v7  ;;  %1380 = vmatpush.bf16.msra.mxu2 %v2856_v6  ;;  %v2649_v6 = vld [vmem:[#allocation5 + $0xb0] sm:$0xf0]  ;;  %v2796_v8 = vor.u32 %v3793_v61, %v2793_v62 }
  0x3a   :  { %v2839_v12 = vld [vmem:[#allocation5 + $0x220] sm:$0xf]  ;;  %v3807_v13 = vld [vmem:[#allocation5 + $0x22c] sm:$0xf0]  ;;  %v2712_v20 = vor.u32 %v3775_v11, %v2711_v9  ;;  %1393 = vmatpush.bf16.msra.mxu3 %v2984_v10  ;;  %v3789_v10 = vld [vmem:[#allocation5 + $0x1a4] sm:$0xf] }
  0x3b   :  { %v2967_v14 = vld [vmem:[#allocation5 + $0x320] sm:$0xf]  ;;  %v3839_v15 = vld [vmem:[#allocation5 + $0x32c] sm:$0xf0]  ;;  %v2840_v21 = vor.u32 %v3807_v13, %v2839_v12  ;;  %1355 = vmatpush.bf16.msra.mxu0 %v2584_v16  ;;  %v2777_v11 = vld [vmem:[#allocation5 + $0x1b0] sm:$0xf0]  ;;  %v2652_v13 = vor.u32 %v3757_v5, %v2649_v6 }
  0x3c   :  { %v2567_v17 = vld [vmem:[#allocation5] sm:$0xf]  ;;  %v3739_v18 = vld [vmem:[#allocation5 + $0xc] sm:$0xf0]  ;;  %v2968_v25 = vor.u32 %v3839_v15, %v2967_v14  ;;  %1368 = vmatpush.bf16.msra.mxu1 %v2712_v20  ;;  %v2780_v20 = vor.u32 %v3789_v10, %v2777_v11  ;;  %v2601_v44 = vld [vmem:[#allocation5 + $0x50] sm:$0xf0] }
  0x3d   :  { %v2695_v19 = vld [vmem:[#allocation5 + $0x100] sm:$0xf]  ;;  %v3771_v22 = vld [vmem:[#allocation5 + $0x10c] sm:$0xf0]  ;;  %v2568_v32 = vor.u32 %v3739_v18, %v2567_v17  ;;  %1381 = vmatpush.bf16.msra.mxu2 %v2840_v21  ;;  %v3753_v18 = vld [vmem:[#allocation5 + $0x84] sm:$0xf] }
  0x3e   :  { %v2823_v23 = vld [vmem:[#allocation5 + $0x200] sm:$0xf]  ;;  %v3803_v24 = vld [vmem:[#allocation5 + $0x20c] sm:$0xf0]  ;;  %v2696_v36 = vor.u32 %v3771_v22, %v2695_v19  ;;  %1394 = vmatpush.bf16.msra.mxu3 %v2968_v25  ;;  %v2633_v19 = vld [vmem:[#allocation5 + $0x90] sm:$0xf0] }
  0x3f   :  { %v2951_v26 = vld [vmem:[#allocation5 + $0x300] sm:$0xf]  ;;  %v3835_v27 = vld [vmem:[#allocation5 + $0x30c] sm:$0xf0]  ;;  %v2824_v37 = vor.u32 %v3803_v24, %v2823_v23  ;;  %1356 = vmatpush.bf16.msra.mxu0 %v2568_v32  ;;  %v3785_v22 = vld [vmem:[#allocation5 + $0x184] sm:$0xf]  ;;  %v2636_v25 = vor.u32 %v3753_v18, %v2633_v19 }
  0x40   :  { %v3191_v28 = vld [vmem:[#allocation5 + $0x4e0] sm:$0xf]  ;;  %v3895_v29 = vld [vmem:[#allocation5 + $0x4ec] sm:$0xf0]  ;;  %v2952_v41 = vor.u32 %v3835_v27, %v2951_v26  ;;  %1369 = vmatpush.bf16.msra.mxu1 %v2696_v36  ;;  %v2761_v23 = vld [vmem:[#allocation5 + $0x190] sm:$0xf0] }
  0x41   :  { %v3319_v30 = vld [vmem:[#allocation5 + $0x5e0] sm:$0xf]  ;;  %v3927_v31 = vld [vmem:[#allocation5 + $0x5ec] sm:$0xf0]  ;;  %v3192_v42 = vor.u32 %v3895_v29, %v3191_v28  ;;  %1382 = vmatpush.bf16.msra.mxu2 %v2824_v37  ;;  %v151_v32 = vld [vmem:[#allocation2 + $0x30] sm:$0xff]  ;;  %v2764_v33 = vor.u32 %v3785_v22, %v2761_v23 }
  0x42   :  { %v3335_v38 = vld [vmem:[#allocation5 + $0x600] sm:$0xf]  ;;  %v3931_v39 = vld [vmem:[#allocation5 + $0x60c] sm:$0xf0]  ;;  %v3320_v46 = vor.u32 %v3927_v31, %v3319_v30  ;;  %1395 = vmatpush.bf16.msra.mxu3 %v2952_v41  ;;  %1357 = vmatmul.bf16.vlgmr.msra.gmra.mxu0 %v4345_v55  ;;  %v3749_v30 = vld [vmem:[#allocation5 + $0x64] sm:$0xf] }
  0x43   :  { %v148_v45 = vld [vmem:[#allocation2 + $0x18] sm:$0xff]  ;;  %v3891_v49 = vld [vmem:[#allocation5 + $0x4cc] sm:$0xf0]  ;;  %v3336_v56 = vor.u32 %v3931_v39, %v3335_v38  ;;  %1401 = vmatpush.bf16.msrb.mxu0 %v3192_v42  ;;  %v2617_v31 = vld [vmem:[#allocation5 + $0x70] sm:$0xf0] }
  0x44   :  { %v3175_v48 = vld [vmem:[#allocation5 + $0x4c0] sm:$0xf]  ;;  %v3923_v52 = vld [vmem:[#allocation5 + $0x5cc] sm:$0xf0]  ;;  %v4347_v57 = vpack.c.bf16 %v148_v45, %v148_v45  ;;  %1414 = vmatpush.bf16.msrb.mxu1 %v3320_v46  ;;  %1383 = vmatmul.bf16.vlgmr.msra.gmra.mxu2 %v4343_v51  ;;  %v2745_v36 = vld [vmem:[#allocation5 + $0x170] sm:$0xf0]  ;;  %v2620_v38 = vor.u32 %v3749_v30, %v2617_v31  ;;  %v4355_v45 = vpack.c.bf16 %v151_v32, %v151_v32 }
  0x45   :  { %v3303_v50 = vld [vmem:[#allocation5 + $0x5c0] sm:$0xf]  ;;  %v146_v58 = vld [vmem:[#allocation2 + $0x8] sm:$0xff]  ;;  %v3176_v60 = vor.u32 %v3891_v49, %v3175_v48  ;;  %1434 = vmatpush.bf16.msrb.mxu2 %v3336_v56  ;;  %v2748_v46 = vor.u32 %v3781_v35, %v2745_v36  ;;  %v3777_v48 = vld [vmem:[#allocation5 + $0x144] sm:$0xf] }
  0x46   :  { %1440 = vmatpush.bf16.msrb.mxu3 %v2684_v47  ;;  %v3304_v63 = vor.u32 %v3923_v52, %v3303_v50  ;;  %v3159_v1 = vld [vmem:[#allocation5 + $0x4a0] sm:$0xf]  ;;  %v3887_v2 = vld [vmem:[#allocation5 + $0x4ac] sm:$0xf0]  ;;  %v4351_v7 = vpack.c.bf16 %v146_v58, %v146_v58  ;;  %v2729_v49 = vld [vmem:[#allocation5 + $0x150] sm:$0xf0]  ;;  %v2604_v52 = vor.u32 %v3745_v43, %v2601_v44 }
  0x47   :  { %v3287_v3 = vld [vmem:[#allocation5 + $0x5a0] sm:$0xf]  ;;  %v3919_v4 = vld [vmem:[#allocation5 + $0x5ac] sm:$0xf0]  ;;  %1396 = vmatmul.bf16.vlgmr.msra.gmra.mxu3 %v4347_v57  ;;  %1402 = vmatpush.bf16.msrb.mxu0 %v3176_v60  ;;  %v3160_v9 = vor.u32 %v3887_v2, %v3159_v1  ;;  %v2585_v60 = vld [vmem:[#allocation5 + $0x30] sm:$0xf0]  ;;  %v2732_v61 = vor.u32 %v3777_v48, %v2729_v49 }
  0x48   :  { %1415 = vmatpush.bf16.msrb.mxu1 %v3304_v63  ;;  %v3288_v12 = vor.u32 %v3919_v4, %v3287_v3  ;;  %v3143_v14 = vld [vmem:[#allocation5 + $0x480] sm:$0xf]  ;;  %v3883_v15 = vld [vmem:[#allocation5 + $0x48c] sm:$0xf0]  ;;  %v3773_v63 = vld [vmem:[#allocation5 + $0x124] sm:$0xf] }
  0x49   :  { %1453 = vmatpush.bf16.msra.mxu2 %v2812_v59  ;;  %v3271_v16 = vld [vmem:[#allocation5 + $0x580] sm:$0xf]  ;;  %1370 = vmatmul.bf16.vlgmr.msra.gmra.mxu1 %v4351_v7  ;;  %v3915_v17 = vld [vmem:[#allocation5 + $0x58c] sm:$0xf0]  ;;  %v3144_v21 = vor.u32 %v3883_v15, %v3143_v14  ;;  %v3741_v59 = vld [vmem:[#allocation5 + $0x24] sm:$0xf] }
  0x4a   :  { %1441 = vmatpush.bf16.msrb.mxu3 %v2668_v0  ;;  %v3272_v24 = vor.u32 %v3915_v17, %v3271_v16  ;;  %v3127_v26 = vld [vmem:[#allocation5 + $0x460] sm:$0xf]  ;;  %v3879_v27 = vld [vmem:[#allocation5 + $0x46c] sm:$0xf0]  ;;  %v2713_v0 = vld [vmem:[#allocation5 + $0x130] sm:$0xf0]  ;;  %v2588_v3 = vor.u32 %v3741_v59, %v2585_v60 }
  0x4b   :  { %1403 = vmatpush.bf16.msrb.mxu0 %v3160_v9  ;;  %v3255_v28 = vld [vmem:[#allocation5 + $0x560] sm:$0xf]  ;;  %v3911_v29 = vld [vmem:[#allocation5 + $0x56c] sm:$0xf0]  ;;  %v3128_v34 = vor.u32 %v3879_v27, %v3127_v26  ;;  %v2569_v9 = vld [vmem:[#allocation5 + $0x10] sm:$0xf0]  ;;  %v2716_v14 = vor.u32 %v3773_v63, %v2713_v0 }
  0x4c   :  { %1416 = vmatpush.bf16.msrb.mxu1 %v3288_v12  ;;  %v3256_v37 = vor.u32 %v3911_v29, %v3255_v28  ;;  %v3111_v39 = vld [vmem:[#allocation5 + $0x440] sm:$0xf]  ;;  %v3875_v40 = vld [vmem:[#allocation5 + $0x44c] sm:$0xf0]  ;;  %v3829_v10 = vld [vmem:[#allocation5 + $0x2e4] sm:$0xf] }
  0x4d   :  { %1454 = vmatpush.bf16.msra.mxu2 %v2796_v8  ;;  %v3239_v41 = vld [vmem:[#allocation5 + $0x540] sm:$0xf]  ;;  %v3907_v42 = vld [vmem:[#allocation5 + $0x54c] sm:$0xf0]  ;;  %v3112_v47 = vor.u32 %v3875_v40, %v3111_v39  ;;  %v3737_v8 = vld [vmem:[#allocation5 + $0x4] sm:$0xf] }
  0x4e   :  { %1442 = vmatpush.bf16.msrb.mxu3 %v2652_v13  ;;  %v3240_v50 = vor.u32 %v3907_v42, %v3239_v41  ;;  %v3095_v53 = vld [vmem:[#allocation5 + $0x420] sm:$0xf]  ;;  %v3871_v54 = vld [vmem:[#allocation5 + $0x42c] sm:$0xf0]  ;;  %v2937_v11 = vld [vmem:[#allocation5 + $0x2f0] sm:$0xf0] }
  0x4f   :  { %1404 = vmatpush.bf16.msrb.mxu0 %v3144_v21  ;;  %v3223_v56 = vld [vmem:[#allocation5 + $0x520] sm:$0xf]  ;;  %v3903_v58 = vld [vmem:[#allocation5 + $0x52c] sm:$0xf0]  ;;  %v3096_v62 = vor.u32 %v3871_v54, %v3095_v53  ;;  %v3861_v12 = vld [vmem:[#allocation5 + $0x3e4] sm:$0xf] }
  0x50   :  { %1417 = vmatpush.bf16.msrb.mxu1 %v3272_v24  ;;  %v3079_v1 = vld [vmem:[#allocation5 + $0x400] sm:$0xf]  ;;  %v3224_v2 = vor.u32 %v3903_v58, %v3223_v56  ;;  %v3867_v4 = vld [vmem:[#allocation5 + $0x40c] sm:$0xf0]  ;;  %v3065_v13 = vld [vmem:[#allocation5 + $0x3f0] sm:$0xf0]  ;;  %v2940_v24 = vor.u32 %v3829_v10, %v2937_v11 }
  0x51   :  { %1455 = vmatpush.bf16.msra.mxu2 %v2780_v20  ;;  %v3207_v5 = vld [vmem:[#allocation5 + $0x500] sm:$0xf]  ;;  %v3899_v6 = vld [vmem:[#allocation5 + $0x50c] sm:$0xf0]  ;;  %v3080_v15 = vor.u32 %v3867_v4, %v3079_v1  ;;  %v3893_v16 = vld [vmem:[#allocation5 + $0x4e4] sm:$0xf]  ;;  %v2572_v20 = vor.u32 %v3737_v8, %v2569_v9 }
  0x52   :  { %1443 = vmatpush.bf16.msrb.mxu3 %v2636_v25  ;;  %v3193_v17 = vld [vmem:[#allocation5 + $0x4f0] sm:$0xf0]  ;;  %v149_v18 = vld [vmem:[#allocation2 + $0x20] sm:$0xff]  ;;  %v3208_v19 = vor.u32 %v3899_v6, %v3207_v5  ;;  %v3769_v21 = vld [vmem:[#allocation5 + $0x104] sm:$0xf]  ;;  %v3068_v25 = vor.u32 %v3861_v12, %v3065_v13 }
  0x53   :  { %1405 = vmatpush.bf16.msrb.mxu0 %v3128_v34  ;;  %v2697_v22 = vld [vmem:[#allocation5 + $0x110] sm:$0xf0]  ;;  %v3925_v26 = vld [vmem:[#allocation5 + $0x5e4] sm:$0xf]  ;;  %v3196_v29 = vor.u32 %v3893_v16, %v3193_v17  ;;  %v4359_v30 = vpack.c.bf16 %v149_v18, %v149_v18 }
  0x54   :  { %1418 = vmatpush.bf16.msrb.mxu1 %v3256_v37  ;;  %3349 = vmatmul.msk.bf16.vlgmr.msrb.gmra.mxu2 %vm1345_vm0, %v4355_v45  ;;  %v150_v23 = vld [vmem:[#allocation2 + $0x28] sm:$0xff]  ;;  %v3825_v28 = vld [vmem:[#allocation5 + $0x2c4] sm:$0xf]  ;;  %v2700_v34 = vor.u32 %v3769_v21, %v2697_v22 }
  0x55   :  { %1456 = vmatpush.bf16.msra.mxu2 %v2764_v33  ;;  %v3321_v27 = vld [vmem:[#allocation5 + $0x5f0] sm:$0xf0]  ;;  %v3857_v32 = vld [vmem:[#allocation5 + $0x3c4] sm:$0xf]  ;;  %v4361_v35 = vpack.c.bf16 %v150_v23, %v150_v23 }
  0x56   :  { %1444 = vmatpush.bf16.msrb.mxu3 %v2620_v38  ;;  %v2921_v31 = vld [vmem:[#allocation5 + $0x2d0] sm:$0xf0]  ;;  %v3889_v36 = vld [vmem:[#allocation5 + $0x4c4] sm:$0xf]  ;;  %v3324_v38 = vor.u32 %v3925_v26, %v3321_v27 }
  0x57   :  { %1406 = vmatpush.bf16.msrb.mxu0 %v3112_v47  ;;  %v3049_v33 = vld [vmem:[#allocation5 + $0x3d0] sm:$0xf0]  ;;  %v2924_v39 = vor.u32 %v3825_v28, %v2921_v31  ;;  %v3921_v41 = vld [vmem:[#allocation5 + $0x5c4] sm:$0xf] }
  0x58   :  { %1419 = vmatpush.bf16.msrb.mxu1 %v3240_v50  ;;  %v3177_v37 = vld [vmem:[#allocation5 + $0x4d0] sm:$0xf0]  ;;  %v3052_v40 = vor.u32 %v3857_v32, %v3049_v33  ;;  %v3821_v43 = vld [vmem:[#allocation5 + $0x2a4] sm:$0xf] }
  0x59   :  { %1457 = vmatpush.bf16.msra.mxu2 %v2748_v46  ;;  %v3305_v42 = vld [vmem:[#allocation5 + $0x5d0] sm:$0xf0]  ;;  %v3180_v44 = vor.u32 %v3889_v36, %v3177_v37  ;;  %v3853_v47 = vld [vmem:[#allocation5 + $0x3a4] sm:$0xf] }
  0x5a   :  { %1445 = vmatpush.bf16.msrb.mxu3 %v2604_v52  ;;  %v2905_v46 = vld [vmem:[#allocation5 + $0x2b0] sm:$0xf0]  ;;  %v3885_v49 = vld [vmem:[#allocation5 + $0x4a4] sm:$0xf]  ;;  %v3308_v52 = vor.u32 %v3921_v41, %v3305_v42 }
  0x5b   :  { %1407 = vmatpush.bf16.msrb.mxu0 %v3096_v62  ;;  %v3033_v48 = vld [vmem:[#allocation5 + $0x3b0] sm:$0xf0]  ;;  %v2908_v53 = vor.u32 %v3821_v43, %v2905_v46  ;;  %v3917_v56 = vld [vmem:[#allocation5 + $0x5a4] sm:$0xf] }
  0x5c   :  { %1420 = vmatpush.bf16.msrb.mxu1 %v3224_v2  ;;  %v3161_v50 = vld [vmem:[#allocation5 + $0x4b0] sm:$0xf0]  ;;  %v3036_v54 = vor.u32 %v3853_v47, %v3033_v48  ;;  %v3817_v59 = vld [vmem:[#allocation5 + $0x284] sm:$0xf] }
  0x5d   :  { %1458 = vmatpush.bf16.msra.mxu2 %v2732_v61  ;;  %v3289_v58 = vld [vmem:[#allocation5 + $0x5b0] sm:$0xf0]  ;;  %v3164_v60 = vor.u32 %v3885_v49, %v3161_v50  ;;  %v3849_v62 = vld [vmem:[#allocation5 + $0x384] sm:$0xf] }
  0x5e   :  { %1446 = vmatpush.bf16.msrb.mxu3 %v2588_v3  ;;  %v2889_v61 = vld [vmem:[#allocation5 + $0x290] sm:$0xf0]  ;;  %v3881_v0 = vld [vmem:[#allocation5 + $0x484] sm:$0xf]  ;;  %v3292_v2 = vor.u32 %v3917_v56, %v3289_v58  ;;  %v2687_v56 = vld [vmem:[#allocation5 + $0xe8] sm:$0xf] }
  0x5f   :  { %1408 = vmatpush.bf16.msrb.mxu0 %v3080_v15  ;;  %v3017_v63 = vld [vmem:[#allocation5 + $0x390] sm:$0xf0]  ;;  %v2892_v3 = vor.u32 %v3817_v59, %v2889_v61  ;;  %v3913_v5 = vld [vmem:[#allocation5 + $0x584] sm:$0xf]  ;;  %v3768_v58 = vld [vmem:[#allocation5 + $0xf4] sm:$0xf0] }
  0x60   :  { %1421 = vmatpush.bf16.msrb.mxu1 %v3208_v19  ;;  %v3145_v1 = vld [vmem:[#allocation5 + $0x490] sm:$0xf0]  ;;  %v3020_v4 = vor.u32 %v3849_v62, %v3017_v63  ;;  %v3813_v8 = vld [vmem:[#allocation5 + $0x264] sm:$0xf]  ;;  %v2943_v62 = vld [vmem:[#allocation5 + $0x2e8] sm:$0xf] }
  0x61   :  { %1459 = vmatpush.bf16.msra.mxu2 %v2716_v14  ;;  %v3273_v6 = vld [vmem:[#allocation5 + $0x590] sm:$0xf0]  ;;  %v3148_v9 = vor.u32 %v3881_v0, %v3145_v1  ;;  %v3845_v11 = vld [vmem:[#allocation5 + $0x364] sm:$0xf]  ;;  %v3832_v63 = vld [vmem:[#allocation5 + $0x2f4] sm:$0xf0] }
  0x62   :  { %1447 = vmatpush.bf16.msrb.mxu3 %v2572_v20  ;;  %1409 = vmatmul.bf16.vlgmr.msrb.gmra.mxu0 %v4359_v30  ;;  %v2873_v10 = vld [vmem:[#allocation5 + $0x270] sm:$0xf0]  ;;  %v3877_v13 = vld [vmem:[#allocation5 + $0x464] sm:$0xf]  ;;  %v3276_v15 = vor.u32 %v3913_v5, %v3273_v6  ;;  %v2688_v5 = vor.u32 %v3768_v58, %v2687_v56  ;;  %v3071_v6 = vld [vmem:[#allocation5 + $0x3e8] sm:$0xf] }
  0x63   :  { %1466 = vmatpush.bf16.msra.mxu0 %v2940_v24  ;;  %1422 = vmatmul.bf16.vlgmr.msrb.gmra.mxu1 %v4361_v35  ;;  %v3001_v12 = vld [vmem:[#allocation5 + $0x370] sm:$0xf0]  ;;  %v2876_v16 = vor.u32 %v3813_v8, %v2873_v10  ;;  %v3909_v18 = vld [vmem:[#allocation5 + $0x564] sm:$0xf]  ;;  %v3864_v8 = vld [vmem:[#allocation5 + $0x3f4] sm:$0xf0] }
  0x64   :  { %1479 = vmatpush.bf16.msra.mxu1 %v3068_v25  ;;  %v3129_v14 = vld [vmem:[#allocation5 + $0x470] sm:$0xf0]  ;;  %v3004_v17 = vor.u32 %v3845_v11, %v3001_v12  ;;  %v3809_v20 = vld [vmem:[#allocation5 + $0x244] sm:$0xf]  ;;  %v2815_v10 = vld [vmem:[#allocation5 + $0x1e8] sm:$0xf]  ;;  %v2944_v12 = vor.u32 %v3832_v63, %v2943_v62 }
  0x65   :  { %1460 = vmatpush.bf16.msra.mxu2 %v2700_v34  ;;  %1448 = vmatmul.bf16.vlgmr.msrb.gmra.mxu3 %v4345_v55  ;;  %v3257_v19 = vld [vmem:[#allocation5 + $0x570] sm:$0xf0]  ;;  %v3132_v21 = vor.u32 %v3877_v13, %v3129_v14  ;;  %v3841_v23 = vld [vmem:[#allocation5 + $0x344] sm:$0xf]  ;;  %v3800_v11 = vld [vmem:[#allocation5 + $0x1f4] sm:$0xf0] }
  0x66   :  { %1492 = vmatpush.bf16.msra.mxu3 %v3196_v29  ;;  %v2857_v22 = vld [vmem:[#allocation5 + $0x250] sm:$0xf0]  ;;  %v3873_v25 = vld [vmem:[#allocation5 + $0x444] sm:$0xf]  ;;  %v3260_v27 = vor.u32 %v3909_v18, %v3257_v19  ;;  %v2671_v14 = vld [vmem:[#allocation5 + $0xc8] sm:$0xf]  ;;  %v2816_v19 = vor.u32 %v3800_v11, %v2815_v10 }
  0x67   :  { %1467 = vmatpush.bf16.msra.mxu0 %v2924_v39  ;;  %v2985_v24 = vld [vmem:[#allocation5 + $0x350] sm:$0xf0]  ;;  %v2860_v28 = vor.u32 %v3809_v20, %v2857_v22  ;;  %v3905_v31 = vld [vmem:[#allocation5 + $0x544] sm:$0xf]  ;;  %v3828_v18 = vld [vmem:[#allocation5 + $0x2d4] sm:$0xf0] }
  0x68   :  { %1480 = vmatpush.bf16.msra.mxu1 %v3052_v40  ;;  %1461 = vmatmul.bf16.vlgmr.msra.gmra.mxu2 %v4351_v7  ;;  %v3113_v26 = vld [vmem:[#allocation5 + $0x450] sm:$0xf0]  ;;  %v2988_v29 = vor.u32 %v3841_v23, %v2985_v24  ;;  %v3805_v33 = vld [vmem:[#allocation5 + $0x224] sm:$0xf]  ;;  %v3055_v20 = vld [vmem:[#allocation5 + $0x3c8] sm:$0xf] }
  0x69   :  { %1505 = vmatpush.bf16.msrb.mxu2 %v3324_v38  ;;  %v3241_v32 = vld [vmem:[#allocation5 + $0x550] sm:$0xf0]  ;;  %v3116_v34 = vor.u32 %v3873_v25, %v3113_v26  ;;  %v3837_v37 = vld [vmem:[#allocation5 + $0x324] sm:$0xf]  ;;  %v2799_v23 = vld [vmem:[#allocation5 + $0x1c8] sm:$0xf] }
  0x6a   :  { %1493 = vmatpush.bf16.msra.mxu3 %v3180_v44  ;;  %v2841_v36 = vld [vmem:[#allocation5 + $0x230] sm:$0xf0]  ;;  %v3869_v39 = vld [vmem:[#allocation5 + $0x424] sm:$0xf]  ;;  %v3244_v42 = vor.u32 %v3905_v31, %v3241_v32  ;;  %v3796_v24 = vld [vmem:[#allocation5 + $0x1d4] sm:$0xf0] }
  0x6b   :  { %1468 = vmatpush.bf16.msra.mxu0 %v2908_v53  ;;  %v2969_v38 = vld [vmem:[#allocation5 + $0x330] sm:$0xf0]  ;;  %v3901_v41 = vld [vmem:[#allocation5 + $0x524] sm:$0xf]  ;;  %v2844_v47 = vor.u32 %v3805_v33, %v2841_v36  ;;  %v2655_v26 = vld [vmem:[#allocation5 + $0xa8] sm:$0xf]  ;;  %v2800_v32 = vor.u32 %v3796_v24, %v2799_v23 }
  0x6c   :  { %1481 = vmatpush.bf16.msra.mxu1 %v3036_v54  ;;  %v3097_v40 = vld [vmem:[#allocation5 + $0x430] sm:$0xf0]  ;;  %v3801_v44 = vld [vmem:[#allocation5 + $0x204] sm:$0xf]  ;;  %v2972_v48 = vor.u32 %v3837_v37, %v2969_v38  ;;  %v3824_v31 = vld [vmem:[#allocation5 + $0x2b4] sm:$0xf0] }
  0x6d   :  { %1506 = vmatpush.bf16.msrb.mxu2 %v3308_v52  ;;  %v3225_v43 = vld [vmem:[#allocation5 + $0x530] sm:$0xf0]  ;;  %v3833_v49 = vld [vmem:[#allocation5 + $0x304] sm:$0xf]  ;;  %v3100_v53 = vor.u32 %v3869_v39, %v3097_v40  ;;  %v3039_v33 = vld [vmem:[#allocation5 + $0x3a8] sm:$0xf] }
  0x6e   :  { %1494 = vmatpush.bf16.msra.mxu3 %v3164_v60  ;;  %v2825_v46 = vld [vmem:[#allocation5 + $0x210] sm:$0xf0]  ;;  %v3865_v52 = vld [vmem:[#allocation5 + $0x404] sm:$0xf]  ;;  %v3228_v60 = vor.u32 %v3901_v41, %v3225_v43  ;;  %v2783_v37 = vld [vmem:[#allocation5 + $0x1a8] sm:$0xf] }
  0x6f   :  { %1469 = vmatpush.bf16.msra.mxu0 %v2892_v3  ;;  %v2953_v50 = vld [vmem:[#allocation5 + $0x310] sm:$0xf0]  ;;  %v3929_v59 = vld [vmem:[#allocation5 + $0x604] sm:$0xf]  ;;  %v2828_v0 = vor.u32 %v3801_v44, %v2825_v46  ;;  %v3792_v38 = vld [vmem:[#allocation5 + $0x1b4] sm:$0xf0] }
  0x70   :  { %1482 = vmatpush.bf16.msra.mxu1 %v3020_v4  ;;  %v3081_v54 = vld [vmem:[#allocation5 + $0x410] sm:$0xf0]  ;;  %v2956_v1 = vor.u32 %v3833_v49, %v2953_v50  ;;  %v2639_v40 = vld [vmem:[#allocation5 + $0x88] sm:$0xf]  ;;  %v3756_v41 = vld [vmem:[#allocation5 + $0x94] sm:$0xf0]  ;;  %v2784_v46 = vor.u32 %v3792_v38, %v2783_v37 }
  0x71   :  { %1507 = vmatpush.bf16.msrb.mxu2 %v3292_v2  ;;  %v3337_v61 = vld [vmem:[#allocation5 + $0x610] sm:$0xf0]  ;;  %v3897_v2 = vld [vmem:[#allocation5 + $0x504] sm:$0xf]  ;;  %v3084_v4 = vor.u32 %v3865_v52, %v3081_v54  ;;  %v2895_v43 = vld [vmem:[#allocation5 + $0x288] sm:$0xf]  ;;  %v2640_v49 = vor.u32 %v3756_v41, %v2639_v40 }
  0x72   :  { %1495 = vmatpush.bf16.msra.mxu3 %v3148_v9  ;;  %v3209_v3 = vld [vmem:[#allocation5 + $0x510] sm:$0xf0]  ;;  %v3340_v9 = vor.u32 %v3929_v59, %v3337_v61  ;;  %v3820_v44 = vld [vmem:[#allocation5 + $0x294] sm:$0xf0]  ;;  %v2767_v50 = vld [vmem:[#allocation5 + $0x188] sm:$0xf] }
  0x73   :  { %1470 = vmatpush.bf16.msra.mxu0 %v2876_v16  ;;  %v3212_v13 = vor.u32 %v3897_v2, %v3209_v3  ;;  %v3072_v16 = vor.u32 %v3864_v8, %v3071_v6  ;;  %v3788_v52 = vld [vmem:[#allocation5 + $0x194] sm:$0xf0]  ;;  %v2623_v54 = vld [vmem:[#allocation5 + $0x68] sm:$0xf] }
  0x74   :  { %1483 = vmatpush.bf16.msra.mxu1 %v3004_v17  ;;  %v2927_v17 = vld [vmem:[#allocation5 + $0x2c8] sm:$0xf]  ;;  %v3752_v56 = vld [vmem:[#allocation5 + $0x74] sm:$0xf0]  ;;  %v2768_v61 = vor.u32 %v3788_v52, %v2767_v50 }
  0x75   :  { %1508 = vmatpush.bf16.msrb.mxu2 %v3276_v15  ;;  %v3764_v15 = vld [vmem:[#allocation5 + $0xd4] sm:$0xf0]  ;;  %v2928_v25 = vor.u32 %v3828_v18, %v2927_v17  ;;  %v2879_v59 = vld [vmem:[#allocation5 + $0x268] sm:$0xf] }
  0x76   :  { %1496 = vmatpush.bf16.msra.mxu3 %v3132_v21  ;;  %v3860_v21 = vld [vmem:[#allocation5 + $0x3d4] sm:$0xf0]  ;;  %v2672_v22 = vor.u32 %v3764_v15, %v2671_v14  ;;  %v3007_v62 = vld [vmem:[#allocation5 + $0x368] sm:$0xf] }
  0x77   :  { %1471 = vmatpush.bf16.msra.mxu0 %v2860_v28  ;;  %v3056_v28 = vor.u32 %v3860_v21, %v3055_v20  ;;  %v3848_v63 = vld [vmem:[#allocation5 + $0x374] sm:$0xf0]  ;;  %v2863_v8 = vld [vmem:[#allocation5 + $0x248] sm:$0xf] }
  0x78   :  { %1484 = vmatpush.bf16.msra.mxu1 %v2988_v29  ;;  %v2911_v29 = vld [vmem:[#allocation5 + $0x2a8] sm:$0xf]  ;;  %v3784_v2 = vld [vmem:[#allocation5 + $0x174] sm:$0xf0]  ;;  %v3008_v6 = vor.u32 %v3848_v63, %v3007_v62 }
  0x79   :  { %1509 = vmatpush.bf16.msrb.mxu2 %v3260_v27  ;;  %v3760_v27 = vld [vmem:[#allocation5 + $0xb4] sm:$0xf0]  ;;  %v2912_v39 = vor.u32 %v3824_v31, %v2911_v29  ;;  %v2991_v11 = vld [vmem:[#allocation5 + $0x348] sm:$0xf] }
  0x7a   :  { %1497 = vmatpush.bf16.msra.mxu3 %v3116_v34  ;;  %v3856_v34 = vld [vmem:[#allocation5 + $0x3b4] sm:$0xf0]  ;;  %v2656_v36 = vor.u32 %v3760_v27, %v2655_v26  ;;  %v2735_v14 = vld [vmem:[#allocation5 + $0x148] sm:$0xf] }
  0x7b   :  { %1472 = vmatpush.bf16.msra.mxu0 %v2844_v47  ;;  %v3023_v47 = vld [vmem:[#allocation5 + $0x388] sm:$0xf]  ;;  %v3780_v15 = vld [vmem:[#allocation5 + $0x154] sm:$0xf0] }
  0x7c   :  { %1485 = vmatpush.bf16.msra.mxu1 %v2972_v48  ;;  %v3852_v48 = vld [vmem:[#allocation5 + $0x394] sm:$0xf0]  ;;  %v2591_v17 = vld [vmem:[#allocation5 + $0x28] sm:$0xf] }
  0x7d   :  { %1510 = vmatpush.bf16.msrb.mxu2 %v3244_v42  ;;  %v3040_v42 = vor.u32 %v3856_v34, %v3039_v33  ;;  %v3024_v58 = vor.u32 %v3852_v48, %v3023_v47  ;;  %v3744_v18 = vld [vmem:[#allocation5 + $0x34] sm:$0xf0]  ;;  %v2847_v20 = vld [vmem:[#allocation5 + $0x228] sm:$0xf]  ;;  %v3766_v47 = vld [vmem:[#allocation5 + $0xec] sm:$0xf] }
  0x7e   :  { %1498 = vmatpush.bf16.msra.mxu3 %v3100_v53  ;;  %v2896_v53 = vor.u32 %v3820_v44, %v2895_v43  ;;  %v3808_v21 = vld [vmem:[#allocation5 + $0x234] sm:$0xf0]  ;;  %v2975_v23 = vld [vmem:[#allocation5 + $0x328] sm:$0xf]  ;;  %v2689_v48 = vld [vmem:[#allocation5 + $0xf8] sm:$0xf0] }
  0x7f   :  { %1473 = vmatpush.bf16.msra.mxu0 %v2828_v0  ;;  %v2624_v0 = vor.u32 %v3752_v56, %v2623_v54  ;;  %v3840_v24 = vld [vmem:[#allocation5 + $0x334] sm:$0xf0]  ;;  %v2719_v26 = vld [vmem:[#allocation5 + $0x128] sm:$0xf]  ;;  %v2848_v29 = vor.u32 %v3808_v21, %v2847_v20  ;;  %v2692_v63 = vor.u32 %v3766_v47, %v2689_v48 }
  0x80   :  { %1486 = vmatpush.bf16.msra.mxu1 %v2956_v1  ;;  %v2751_v1 = vld [vmem:[#allocation5 + $0x168] sm:$0xf]  ;;  %v3776_v27 = vld [vmem:[#allocation5 + $0x134] sm:$0xf0]  ;;  %v2976_v34 = vor.u32 %v3840_v24, %v2975_v23  ;;  %v2785_v23 = vld [vmem:[#allocation5 + $0x1b8] sm:$0xf0] }
  0x81   :  { %1511 = vmatpush.bf16.msrb.mxu2 %v3228_v60  ;;  %v3816_v60 = vld [vmem:[#allocation5 + $0x274] sm:$0xf0]  ;;  %v2752_v10 = vor.u32 %v3784_v2, %v2751_v1  ;;  %v2831_v37 = vld [vmem:[#allocation5 + $0x208] sm:$0xf]  ;;  %v2720_v40 = vor.u32 %v3776_v27, %v2719_v26  ;;  %v3762_v1 = vld [vmem:[#allocation5 + $0xcc] sm:$0xf] }
  0x82   :  { %1499 = vmatpush.bf16.msra.mxu3 %v3084_v4  ;;  %1474 = vmatmul.bf16.vlgmr.msra.gmra.mxu0 %v4343_v51  ;;  %v2880_v3 = vor.u32 %v3816_v60, %v2879_v59  ;;  %v2607_v4 = vld [vmem:[#allocation5 + $0x48] sm:$0xf]  ;;  %v3740_v31 = vld [vmem:[#allocation5 + $0x14] sm:$0xf0]  ;;  %v3798_v60 = vld [vmem:[#allocation5 + $0x1ec] sm:$0xf] }
  0x83   :  { %1557 = vmatpush.bf16.msrb.mxu0 %v2944_v12  ;;  %1487 = vmatmul.bf16.vlgmr.msra.gmra.mxu1 %v4347_v57  ;;  %v3844_v12 = vld [vmem:[#allocation5 + $0x354] sm:$0xf0]  ;;  %v3327_v52 = vld [vmem:[#allocation5 + $0x5e8] sm:$0xf]  ;;  %v2673_v2 = vld [vmem:[#allocation5 + $0xd8] sm:$0xf0] }
  0x84   :  { %1531 = vmatpush.bf16.msrb.mxu1 %v2688_v5  ;;  %v3748_v5 = vld [vmem:[#allocation5 + $0x54] sm:$0xf0]  ;;  %v3183_v54 = vld [vmem:[#allocation5 + $0x4c8] sm:$0xf]  ;;  %v3754_v26 = vld [vmem:[#allocation5 + $0x8c] sm:$0xf] }
  0x85   :  { %1512 = vmatpush.bf16.msrb.mxu2 %v3212_v13  ;;  %1500 = vmatmul.bf16.vlgmr.msra.gmra.mxu3 %v4359_v30  ;;  %v2608_v13 = vor.u32 %v3748_v5, %v2607_v4  ;;  %v3896_v33 = vld [vmem:[#allocation5 + $0x4f4] sm:$0xf0]  ;;  %v3311_v5 = vld [vmem:[#allocation5 + $0x5c8] sm:$0xf]  ;;  %v2641_v27 = vld [vmem:[#allocation5 + $0x98] sm:$0xf0] }
  0x86   :  { %1525 = vmatpush.bf16.msrb.mxu3 %v3340_v9  ;;  %v3812_v9 = vld [vmem:[#allocation5 + $0x254] sm:$0xf0]  ;;  %v3151_v20 = vld [vmem:[#allocation5 + $0x488] sm:$0xf] }
  0x87   :  { %1558 = vmatpush.bf16.msrb.mxu0 %v2928_v25  ;;  %v2592_v25 = vor.u32 %v3744_v18, %v2591_v17  ;;  %v3804_v38 = vld [vmem:[#allocation5 + $0x214] sm:$0xf0]  ;;  %v3295_v18 = vld [vmem:[#allocation5 + $0x5a8] sm:$0xf] }
  0x88   :  { %1532 = vmatpush.bf16.msrb.mxu1 %v2672_v22  ;;  %1513 = vmatmul.bf16.vlgmr.msrb.gmra.mxu2 %v4361_v35  ;;  %v2736_v22 = vor.u32 %v3780_v15, %v2735_v14  ;;  %v3836_v41 = vld [vmem:[#allocation5 + $0x314] sm:$0xf0]  ;;  %v2832_v50 = vor.u32 %v3804_v38, %v2831_v37  ;;  %v3758_v14 = vld [vmem:[#allocation5 + $0xac] sm:$0xf]  ;;  %v2657_v15 = vld [vmem:[#allocation5 + $0xb8] sm:$0xf0]  ;;  %v2644_v38 = vor.u32 %v3754_v26, %v2641_v27 }
  0x89   :  { %1570 = vmatpush.bf16.msra.mxu2 %v3072_v16  ;;  %v2864_v16 = vor.u32 %v3812_v9, %v2863_v8  ;;  %v3932_v43 = vld [vmem:[#allocation5 + $0x614] sm:$0xf0]  ;;  %v3167_v8 = vld [vmem:[#allocation5 + $0x4a8] sm:$0xf]  ;;  %v2660_v24 = vor.u32 %v3758_v14, %v2657_v15  ;;  %v2769_v37 = vld [vmem:[#allocation5 + $0x198] sm:$0xf0] }
  0x8a   :  { %1544 = vmatpush.bf16.msra.mxu3 %v2816_v19  ;;  %v2992_v19 = vor.u32 %v3844_v12, %v2991_v11  ;;  %v3888_v9 = vld [vmem:[#allocation5 + $0x4b4] sm:$0xf0]  ;;  %v2801_v11 = vld [vmem:[#allocation5 + $0x1d8] sm:$0xf0]  ;;  %v2676_v12 = vor.u32 %v3762_v1, %v2673_v2  ;;  %v3119_v47 = vld [vmem:[#allocation5 + $0x448] sm:$0xf] }
  0x8b   :  { %1559 = vmatpush.bf16.msrb.mxu0 %v2912_v39  ;;  %v2959_v39 = vld [vmem:[#allocation5 + $0x308] sm:$0xf]  ;;  %v3884_v21 = vld [vmem:[#allocation5 + $0x494] sm:$0xf0]  ;;  %v2737_v1 = vld [vmem:[#allocation5 + $0x158] sm:$0xf0] }
  0x8c   :  { %1533 = vmatpush.bf16.msrb.mxu1 %v2656_v36  ;;  %v2703_v36 = vld [vmem:[#allocation5 + $0x108] sm:$0xf]  ;;  %v2960_v56 = vor.u32 %v3836_v41, %v2959_v39  ;;  %v2625_v41 = vld [vmem:[#allocation5 + $0x78] sm:$0xf0]  ;;  %v3876_v48 = vld [vmem:[#allocation5 + $0x454] sm:$0xf0] }
  0x8d   :  { %1571 = vmatpush.bf16.msra.mxu2 %v3056_v28  ;;  %v2575_v28 = vld [vmem:[#allocation5 + $0x8] sm:$0xf]  ;;  %v2721_v14 = vld [vmem:[#allocation5 + $0x138] sm:$0xf0] }
  0x8e   :  { %1545 = vmatpush.bf16.msra.mxu3 %v2800_v32  ;;  %v3199_v32 = vld [vmem:[#allocation5 + $0x4e8] sm:$0xf]  ;;  %v2576_v44 = vor.u32 %v3740_v31, %v2575_v28  ;;  %v3152_v28 = vor.u32 %v3884_v21, %v3151_v20  ;;  %v3738_v20 = vld [vmem:[#allocation5 + $0xc] sm:$0xf]  ;;  %v2577_v21 = vld [vmem:[#allocation5 + $0x18] sm:$0xf0] }
  0x8f   :  { %1560 = vmatpush.bf16.msrb.mxu0 %v2896_v53  ;;  %v3928_v53 = vld [vmem:[#allocation5 + $0x5f4] sm:$0xf0]  ;;  %v3279_v31 = vld [vmem:[#allocation5 + $0x588] sm:$0xf]  ;;  %v3073_v26 = vld [vmem:[#allocation5 + $0x3f8] sm:$0xf0] }
  0x90   :  { %1534 = vmatpush.bf16.msrb.mxu1 %v2640_v49  ;;  %v3200_v49 = vor.u32 %v3896_v33, %v3199_v32  ;;  %v3916_v32 = vld [vmem:[#allocation5 + $0x594] sm:$0xf0]  ;;  %v3135_v33 = vld [vmem:[#allocation5 + $0x468] sm:$0xf] }
  0x91   :  { %1572 = vmatpush.bf16.msra.mxu2 %v3040_v42  ;;  %v3343_v42 = vld [vmem:[#allocation5 + $0x608] sm:$0xf]  ;;  %v3280_v39 = vor.u32 %v3916_v32, %v3279_v31  ;;  %v3826_v31 = vld [vmem:[#allocation5 + $0x2cc] sm:$0xf]  ;;  %v2580_v32 = vor.u32 %v3738_v20, %v2577_v21 }
  0x92   :  { %1546 = vmatpush.bf16.msra.mxu3 %v2784_v46  ;;  %v3772_v46 = vld [vmem:[#allocation5 + $0x114] sm:$0xf0]  ;;  %v3344_v59 = vor.u32 %v3932_v43, %v3343_v42  ;;  %v3846_v20 = vld [vmem:[#allocation5 + $0x36c] sm:$0xf] }
  0x93   :  { %1561 = vmatpush.bf16.msrb.mxu0 %v2880_v3  ;;  %v2704_v62 = vor.u32 %v3772_v46, %v2703_v36  ;;  %v3786_v36 = vld [vmem:[#allocation5 + $0x18c] sm:$0xf]  ;;  %v3912_v46 = vld [vmem:[#allocation5 + $0x574] sm:$0xf0] }
  0x94   :  { %1535 = vmatpush.bf16.msrb.mxu1 %v2624_v0  ;;  %v3328_v0 = vor.u32 %v3928_v53, %v3327_v52  ;;  %v2772_v43 = vor.u32 %v3786_v36, %v2769_v37  ;;  %v2705_v36 = vld [vmem:[#allocation5 + $0x118] sm:$0xf0] }
  0x95   :  { %1573 = vmatpush.bf16.msra.mxu2 %v3024_v58  ;;  %3350 = vmatmul.msk.bf16.vlgmr.msrb.gmra.mxu3 %vm1345_vm0, %v4355_v45  ;;  %v3892_v58 = vld [vmem:[#allocation5 + $0x4d4] sm:$0xf0] }
  0x96   :  { %1547 = vmatpush.bf16.msra.mxu3 %v2768_v61  ;;  %v2817_v61 = vld [vmem:[#allocation5 + $0x1f8] sm:$0xf0]  ;;  %v3184_v3 = vor.u32 %v3892_v58, %v3183_v54  ;;  %v3746_v54 = vld [vmem:[#allocation5 + $0x4c] sm:$0xf]  ;;  %v3120_v58 = vor.u32 %v3876_v48, %v3119_v47 }
  0x97   :  { %1562 = vmatpush.bf16.msrb.mxu0 %v2864_v16  ;;  %v2820_v4 = vor.u32 %v3798_v60, %v2817_v61  ;;  %v3168_v16 = vor.u32 %v3888_v9, %v3167_v8  ;;  %v3247_v60 = vld [vmem:[#allocation5 + $0x548] sm:$0xf]  ;;  %v3908_v61 = vld [vmem:[#allocation5 + $0x554] sm:$0xf0]  ;;  %v3890_v47 = vld [vmem:[#allocation5 + $0x4cc] sm:$0xf] }
  0x98   :  { %1536 = vmatpush.bf16.msrb.mxu1 %v2608_v13  ;;  %v3231_v9 = vld [vmem:[#allocation5 + $0x528] sm:$0xf]  ;;  %v3185_v48 = vld [vmem:[#allocation5 + $0x4d8] sm:$0xf0] }
  0x99   :  { %1574 = vmatpush.bf16.msra.mxu2 %v3008_v6  ;;  %v3924_v6 = vld [vmem:[#allocation5 + $0x5d4] sm:$0xf0] }
  0x9a   :  { %1548 = vmatpush.bf16.msra.mxu3 %v2752_v10  ;;  %v3794_v10 = vld [vmem:[#allocation5 + $0x1cc] sm:$0xf]  ;;  %v3312_v13 = vor.u32 %v3924_v6, %v3311_v5  ;;  %v2593_v5 = vld [vmem:[#allocation5 + $0x38] sm:$0xf0] }
  0x9b   :  { %1563 = vmatpush.bf16.msrb.mxu0 %v2848_v29  ;;  %v2804_v17 = vor.u32 %v3794_v10, %v2801_v11  ;;  %v3904_v10 = vld [vmem:[#allocation5 + $0x534] sm:$0xf0]  ;;  %v3087_v11 = vld [vmem:[#allocation5 + $0x408] sm:$0xf] }
  0x9c   :  { %1537 = vmatpush.bf16.msrb.mxu1 %v2592_v25 }
  0x9d   :  { %1575 = vmatpush.bf16.msra.mxu2 %v2992_v19  ;;  %v3920_v19 = vld [vmem:[#allocation5 + $0x5b4] sm:$0xf0] }
  0x9e   :  { %1549 = vmatpush.bf16.msra.mxu3 %v2736_v22  ;;  %v3790_v22 = vld [vmem:[#allocation5 + $0x1ac] sm:$0xf]  ;;  %v3296_v25 = vor.u32 %v3920_v19, %v3295_v18  ;;  %v3232_v18 = vor.u32 %v3904_v10, %v3231_v9  ;;  %v3215_v19 = vld [vmem:[#allocation5 + $0x508] sm:$0xf]  ;;  %v3025_v10 = vld [vmem:[#allocation5 + $0x398] sm:$0xf0] }
  0x9f   :  { %1564 = vmatpush.bf16.msrb.mxu0 %v2832_v50  ;;  %v2788_v29 = vor.u32 %v3790_v22, %v2785_v23  ;;  %v2753_v50 = vld [vmem:[#allocation5 + $0x178] sm:$0xf0] }
  0xa0   :  { %1538 = vmatpush.bf16.msrb.mxu1 %v2576_v44  ;;  %v3263_v44 = vld [vmem:[#allocation5 + $0x568] sm:$0xf] }
  0xa1   :  { %1576 = vmatpush.bf16.msra.mxu2 %v2976_v34  ;;  %v3880_v34 = vld [vmem:[#allocation5 + $0x474] sm:$0xf0]  ;;  %v3264_v53 = vor.u32 %v3912_v46, %v3263_v44  ;;  %v3057_v46 = vld [vmem:[#allocation5 + $0x3d8] sm:$0xf0] }
  0xa2   :  { %1550 = vmatpush.bf16.msra.mxu3 %v2720_v40  ;;  %1565 = vmatmul.bf16.vlgmr.msrb.gmra.mxu0 %v4343_v51  ;;  %v3750_v40 = vld [vmem:[#allocation5 + $0x6c] sm:$0xf]  ;;  %v3136_v42 = vor.u32 %v3880_v34, %v3135_v33  ;;  %v2929_v33 = vld [vmem:[#allocation5 + $0x2d8] sm:$0xf0] }
  0xa3   :  { %1616 = vmatpush.bf16.msra.mxu0 %v3344_v59  ;;  %1539 = vmatmul.bf16.vlgmr.msrb.gmra.mxu1 %v4345_v55  ;;  %v2628_v52 = vor.u32 %v3750_v40, %v2625_v41  ;;  %v3770_v34 = vld [vmem:[#allocation5 + $0x10c] sm:$0xf] }
  0xa4   :  { %1583 = vmatpush.bf16.msra.mxu1 %v3200_v49  ;;  %v3782_v49 = vld [vmem:[#allocation5 + $0x16c] sm:$0xf]  ;;  %v2708_v44 = vor.u32 %v3770_v34, %v2705_v36 }
  0xa5   :  { %1577 = vmatpush.bf16.msra.mxu2 %v2960_v56  ;;  %v2609_v56 = vld [vmem:[#allocation5 + $0x58] sm:$0xf0]  ;;  %v2756_v59 = vor.u32 %v3782_v49, %v2753_v50  ;;  %v3822_v50 = vld [vmem:[#allocation5 + $0x2ac] sm:$0xf] }
  0xa6   :  { %1551 = vmatpush.bf16.msra.mxu3 %v2704_v62  ;;  %v3103_v62 = vld [vmem:[#allocation5 + $0x428] sm:$0xf]  ;;  %v2612_v2 = vor.u32 %v3746_v54, %v2609_v56  ;;  %v3313_v54 = vld [vmem:[#allocation5 + $0x5d8] sm:$0xf0]  ;;  %v3842_v34 = vld [vmem:[#allocation5 + $0x34c] sm:$0xf] }
  0xa7   :  { %1635 = vmatpush.bf16.msrb.mxu0 %v2820_v4  ;;  %v3742_v4 = vld [vmem:[#allocation5 + $0x2c] sm:$0xf] }
  0xa8   :  { %1584 = vmatpush.bf16.msra.mxu1 %v3184_v3  ;;  %1578 = vmatmul.bf16.vlgmr.msra.gmra.mxu2 %v4347_v57  ;;  %v3248_v3 = vor.u32 %v3908_v61, %v3247_v60  ;;  %v2596_v15 = vor.u32 %v3742_v4, %v2593_v5  ;;  %v3041_v61 = vld [vmem:[#allocation5 + $0x3b8] sm:$0xf0] }
  0xa9   :  { %1622 = vmatpush.bf16.msrb.mxu2 %v2692_v63  ;;  %1552 = vmatmul.bf16.vlgmr.msra.gmra.mxu3 %v4351_v7  ;;  %v3872_v63 = vld [vmem:[#allocation5 + $0x434] sm:$0xf0]  ;;  %v3297_v4 = vld [vmem:[#allocation5 + $0x5b8] sm:$0xf0] }
  0xaa   :  { %1596 = vmatpush.bf16.msrb.mxu3 %v3328_v0  ;;  %v3778_v0 = vld [vmem:[#allocation5 + $0x14c] sm:$0xf]  ;;  %v3104_v6 = vor.u32 %v3872_v63, %v3103_v62  ;;  %v3169_v63 = vld [vmem:[#allocation5 + $0x4b8] sm:$0xf0] }
  0xab   :  { %1636 = vmatpush.bf16.msrb.mxu0 %v2804_v17  ;;  %v2740_v8 = vor.u32 %v3778_v0, %v2737_v1  ;;  %v2945_v17 = vld [vmem:[#allocation5 + $0x2f8] sm:$0xf0]  ;;  %v3886_v62 = vld [vmem:[#allocation5 + $0x4ac] sm:$0xf] }
  0xac   :  { %1585 = vmatpush.bf16.msra.mxu1 %v3168_v16  ;;  %v3830_v16 = vld [vmem:[#allocation5 + $0x2ec] sm:$0xf] }
  0xad   :  { %1623 = vmatpush.bf16.msrb.mxu2 %v2676_v12  ;;  %v3868_v12 = vld [vmem:[#allocation5 + $0x414] sm:$0xf0]  ;;  %v2948_v27 = vor.u32 %v3830_v16, %v2945_v17  ;;  %v3818_v1 = vld [vmem:[#allocation5 + $0x28c] sm:$0xf]  ;;  %v3281_v17 = vld [vmem:[#allocation5 + $0x598] sm:$0xf0] }
  0xae   :  { %1597 = vmatpush.bf16.msrb.mxu3 %v3312_v13  ;;  %v3774_v13 = vld [vmem:[#allocation5 + $0x12c] sm:$0xf]  ;;  %v3088_v22 = vor.u32 %v3868_v12, %v3087_v11  ;;  %v3153_v12 = vld [vmem:[#allocation5 + $0x498] sm:$0xf0] }
  0xaf   :  { %1637 = vmatpush.bf16.msrb.mxu0 %v2788_v29  ;;  %v2724_v23 = vor.u32 %v3774_v13, %v2721_v14  ;;  %v3201_v29 = vld [vmem:[#allocation5 + $0x4f8] sm:$0xf0]  ;;  %v3882_v11 = vld [vmem:[#allocation5 + $0x48c] sm:$0xf] }
  0xb0   :  { %1586 = vmatpush.bf16.msra.mxu1 %v3152_v28  ;;  %v3894_v28 = vld [vmem:[#allocation5 + $0x4ec] sm:$0xf] }
  0xb1   :  { %1624 = vmatpush.bf16.msrb.mxu2 %v2660_v24  ;;  %v3900_v24 = vld [vmem:[#allocation5 + $0x514] sm:$0xf0]  ;;  %v3204_v41 = vor.u32 %v3894_v28, %v3201_v29  ;;  %v3814_v14 = vld [vmem:[#allocation5 + $0x26c] sm:$0xf]  ;;  %v3265_v29 = vld [vmem:[#allocation5 + $0x578] sm:$0xf0] }
  0xb2   :  { %1598 = vmatpush.bf16.msrb.mxu3 %v3296_v25  ;;  %3351 = vmatmul.msk.bf16.vlgmr.msra.gmra.mxu0 %vm1345_vm0, %v4355_v45  ;;  %v3862_v25 = vld [vmem:[#allocation5 + $0x3ec] sm:$0xf]  ;;  %v3216_v37 = vor.u32 %v3900_v24, %v3215_v19  ;;  %v3156_v19 = vor.u32 %v3882_v11, %v3153_v12  ;;  %v3137_v24 = vld [vmem:[#allocation5 + $0x478] sm:$0xf0] }
  0xb3   :  { %1638 = vmatpush.bf16.msrb.mxu0 %v2772_v43  ;;  %v3076_v40 = vor.u32 %v3862_v25, %v3073_v26  ;;  %v2932_v43 = vor.u32 %v3826_v31, %v2929_v33  ;;  %v3810_v26 = vld [vmem:[#allocation5 + $0x24c] sm:$0xf]  ;;  %v3089_v11 = vld [vmem:[#allocation5 + $0x418] sm:$0xf0] }
  0xb4   :  { %1587 = vmatpush.bf16.msra.mxu1 %v3136_v42  ;;  %v3858_v42 = vld [vmem:[#allocation5 + $0x3cc] sm:$0xf] }
  0xb5   :  { %1625 = vmatpush.bf16.msrb.mxu2 %v2644_v38  ;;  %v3926_v38 = vld [vmem:[#allocation5 + $0x5ec] sm:$0xf]  ;;  %v3060_v56 = vor.u32 %v3858_v42, %v3057_v46 }
  0xb6   :  { %1599 = vmatpush.bf16.msrb.mxu3 %v3280_v39  ;;  %v3329_v39 = vld [vmem:[#allocation5 + $0x5f8] sm:$0xf0]  ;;  %v3910_v28 = vld [vmem:[#allocation5 + $0x56c] sm:$0xf] }
  0xb7   :  { %1639 = vmatpush.bf16.msrb.mxu0 %v2756_v59  ;;  %v3332_v49 = vor.u32 %v3926_v38, %v3329_v39  ;;  %v3854_v59 = vld [vmem:[#allocation5 + $0x3ac] sm:$0xf]  ;;  %v2993_v38 = vld [vmem:[#allocation5 + $0x358] sm:$0xf0] }
  0xb8   :  { %1588 = vmatpush.bf16.msra.mxu1 %v3120_v58  ;;  %v3188_v58 = vor.u32 %v3890_v47, %v3185_v48  ;;  %v3044_v5 = vor.u32 %v3854_v59, %v3041_v61  ;;  %v3874_v39 = vld [vmem:[#allocation5 + $0x44c] sm:$0xf]  ;;  %v3249_v47 = vld [vmem:[#allocation5 + $0x558] sm:$0xf0]  ;;  %v2996_v48 = vor.u32 %v3842_v34, %v2993_v38  ;;  %v3395_v38 = vld [vmem:[#allocation8 + $0x50] sm:$0xf] }
  0xb9   :  { %1626 = vmatpush.bf16.msrb.mxu2 %v2628_v52  ;;  %v2913_v52 = vld [vmem:[#allocation5 + $0x2b8] sm:$0xf0]  ;;  %v3806_v42 = vld [vmem:[#allocation5 + $0x22c] sm:$0xf] }
  0xba   :  { %1600 = vmatpush.bf16.msrb.mxu3 %v3264_v53  ;;  %v3922_v53 = vld [vmem:[#allocation5 + $0x5cc] sm:$0xf]  ;;  %v2916_v60 = vor.u32 %v3822_v50, %v2913_v52 }
  0xbb   :  { %1640 = vmatpush.bf16.msrb.mxu0 %v2740_v8  ;;  %v3316_v0 = vor.u32 %v3922_v53, %v3313_v54  ;;  %v3850_v8 = vld [vmem:[#allocation5 + $0x38c] sm:$0xf]  ;;  %v2977_v53 = vld [vmem:[#allocation5 + $0x338] sm:$0xf0] }
  0xbc   :  { %1589 = vmatpush.bf16.msra.mxu1 %v3104_v6  ;;  %v3172_v6 = vor.u32 %v3886_v62, %v3169_v63  ;;  %v3906_v46 = vld [vmem:[#allocation5 + $0x54c] sm:$0xf]  ;;  %v3233_v63 = vld [vmem:[#allocation5 + $0x538] sm:$0xf0] }
  0xbd   :  { %1627 = vmatpush.bf16.msrb.mxu2 %v2612_v2  ;;  %v2897_v2 = vld [vmem:[#allocation5 + $0x298] sm:$0xf0]  ;;  %v3838_v50 = vld [vmem:[#allocation5 + $0x32c] sm:$0xf] }
  0xbe   :  { %1601 = vmatpush.bf16.msrb.mxu3 %v3248_v3  ;;  %v3918_v3 = vld [vmem:[#allocation5 + $0x5ac] sm:$0xf]  ;;  %v2900_v9 = vor.u32 %v3818_v1, %v2897_v2  ;;  %v3345_v1 = vld [vmem:[#allocation5 + $0x618] sm:$0xf0]  ;;  %v4391_v2 = vld [vmem:[#allocation7] sm:$0xf] }
  0xbf   :  { %1641 = vmatpush.bf16.msrb.mxu0 %v2724_v23  ;;  %v3300_v13 = vor.u32 %v3918_v3, %v3297_v4  ;;  %v4383_v16 = vpop.f32.mrf.mxu0  ;;  %v3878_v23 = vld [vmem:[#allocation5 + $0x46c] sm:$0xf]  ;;  %v2980_v4 = vor.u32 %v3838_v50, %v2977_v53 }
  0xc0   :  { %1590 = vmatpush.bf16.msra.mxu1 %v3088_v22  ;;  %v3009_v22 = vld [vmem:[#allocation5 + $0x378] sm:$0xf0]  ;;  %v3140_v33 = vor.u32 %v3878_v23, %v3137_v24  ;;  %v3870_v54 = vld [vmem:[#allocation5 + $0x42c] sm:$0xf] }
  0xc1   :  { %1628 = vmatpush.bf16.msrb.mxu2 %v2596_v15  ;;  %v2881_v15 = vld [vmem:[#allocation5 + $0x278] sm:$0xf0]  ;;  %v3802_v59 = vld [vmem:[#allocation5 + $0x20c] sm:$0xf] }
  0xc2   :  { %1602 = vmatpush.bf16.msrb.mxu3 %v3232_v18  ;;  %v3028_v18 = vor.u32 %v3850_v8, %v3025_v10  ;;  %v2884_v21 = vor.u32 %v3814_v14, %v2881_v15  ;;  %v3902_v61 = vld [vmem:[#allocation5 + $0x52c] sm:$0xf]  ;;  %v3411_v15 = vld [vmem:[#allocation8 + $0x70] sm:$0xf] }
  0xc3   :  { %1591 = vmatmul.bf16.vlgmr.msra.gmra.mxu1 %v4359_v30  ;;  %1642 = vmatpush.bf16.msrb.mxu0 %v2708_v44  ;;  %v3866_v10 = vld [vmem:[#allocation5 + $0x40c] sm:$0xf] }
  0xc4   :  { %1648 = vmatpush.bf16.msrb.mxu1 %v2948_v27  ;;  %v2865_v27 = vld [vmem:[#allocation5 + $0x258] sm:$0xf0]  ;;  %v3092_v23 = vor.u32 %v3866_v10, %v3089_v11  ;;  %v3427_v11 = vld [vmem:[#allocation8 + $0x90] sm:$0xf] }
  0xc5   :  { %1629 = vmatpush.bf16.msrb.mxu2 %v2580_v32  ;;  %v3012_v32 = vor.u32 %v3846_v20, %v3009_v22  ;;  %v2868_v36 = vor.u32 %v3810_v26, %v2865_v27  ;;  %v3964_v20 = vld [vmem:[#allocation8 + $0xf4] sm:$0xf0]  ;;  %v3403_v26 = vld [vmem:[#allocation8 + $0x60] sm:$0xf]  ;;  %v3946_v27 = vld [vmem:[#allocation8 + $0x64] sm:$0xf0] }
  0xc6   :  { %1603 = vmatpush.bf16.msrb.mxu3 %v3216_v37  ;;  %1643 = vmatmul.bf16.vlgmr.msrb.gmra.mxu0 %v4351_v7  ;;  %v4385_v25 = vpop.f32.mrf.mxu1 }
  0xc7   :  { %1687 = vmatpush.bf16.msra.mxu0 %v3332_v49  ;;  %v4387_v31 = vpop.f32.mrf.mxu2  ;;  %v1360_v44 = vpop.f32.mrf.mxu0 }
  0xc8   :  { %1649 = vmatpush.bf16.msrb.mxu1 %v2932_v43  ;;  %1630 = vmatmul.bf16.vlgmr.msrb.gmra.mxu2 %v4345_v55  ;;  %v3914_v55 = vld [vmem:[#allocation5 + $0x58c] sm:$0xf]  ;;  %v2849_v43 = vld [vmem:[#allocation5 + $0x238] sm:$0xf0] }
  0xc9   :  { %1674 = vmatpush.bf16.msra.mxu2 %v3204_v41  ;;  %1604 = vmatmul.bf16.vlgmr.msrb.gmra.mxu3 %v4361_v35  ;;  %v3284_v7 = vor.u32 %v3914_v55, %v3281_v17  ;;  %v3268_v41 = vor.u32 %v3910_v28, %v3265_v29  ;;  %v2852_v52 = vor.u32 %v3806_v42, %v2849_v43  ;;  %v3948_v55 = vld [vmem:[#allocation8 + $0x74] sm:$0xf0]  ;;  %v3898_v17 = vld [vmem:[#allocation5 + $0x50c] sm:$0xf]  ;;  %v3467_v29 = vld [vmem:[#allocation8 + $0xe0] sm:$0xf] }
  0xca   :  { %1661 = vmatpush.bf16.msra.mxu3 %v3076_v40  ;;  %v4389_v37 = vpop.f32.mrf.mxu3  ;;  %v3121_v40 = vld [vmem:[#allocation5 + $0x458] sm:$0xf0]  ;;  %v3412_v24 = vor.u32 %v3948_v55, %v3411_v15  ;;  %v3942_v44 = vld [vmem:[#allocation8 + $0x44] sm:$0xf0]  ;;  %v3355_v15 = vld [vmem:[#allocation8] sm:$0xf] }
  0xcb   :  { %1688 = vmatpush.bf16.msra.mxu0 %v3316_v0  ;;  %v3124_v49 = vor.u32 %v3874_v39, %v3121_v40  ;;  %v3930_v0 = vld [vmem:[#allocation5 + $0x60c] sm:$0xf]  ;;  %v3944_v39 = vld [vmem:[#allocation8 + $0x54] sm:$0xf0] }
  0xcc   :  { %1650 = vmatpush.bf16.msrb.mxu1 %v2916_v60  ;;  %v2833_v60 = vld [vmem:[#allocation5 + $0x218] sm:$0xf0]  ;;  %v3348_v14 = vor.u32 %v3930_v0, %v3345_v1  ;;  %v3435_v1 = vld [vmem:[#allocation8 + $0xa0] sm:$0xf]  ;;  %v3934_v55 = vld [vmem:[#allocation8 + $0x4] sm:$0xf0] }
  0xcd   :  { %1675 = vmatpush.bf16.msra.mxu2 %v3188_v58  ;;  %v3252_v58 = vor.u32 %v3906_v46, %v3249_v47  ;;  %v2836_v8 = vor.u32 %v3802_v59, %v2833_v60  ;;  %v3960_v42 = vld [vmem:[#allocation8 + $0xd4] sm:$0xf0] }
  0xce   :  { %1662 = vmatpush.bf16.msra.mxu3 %v3060_v56  ;;  %v3105_v56 = vld [vmem:[#allocation5 + $0x438] sm:$0xf0]  ;;  %v1373_v62 = vpop.f32.mrf.mxu1 }
  0xcf   :  { %1689 = vmatpush.bf16.msra.mxu0 %v3300_v13  ;;  %v1386_v3 = vpop.f32.mrf.mxu2  ;;  %v3236_v13 = vor.u32 %v3902_v61, %v3233_v63  ;;  %v3371_v61 = vld [vmem:[#allocation8 + $0x20] sm:$0xf]  ;;  %v3938_v62 = vld [vmem:[#allocation8 + $0x24] sm:$0xf0] }
  0xd0   :  { %1651 = vmatpush.bf16.msrb.mxu1 %v2900_v9  ;;  %v2961_v9 = vld [vmem:[#allocation5 + $0x318] sm:$0xf0]  ;;  %v3954_v3 = vld [vmem:[#allocation8 + $0xa4] sm:$0xf0] }
  0xd1   :  { %1676 = vmatpush.bf16.msra.mxu2 %v3172_v6  ;;  %v3834_v6 = vld [vmem:[#allocation5 + $0x30c] sm:$0xf]  ;;  %v3436_v10 = vor.u32 %v3954_v3, %v3435_v1  ;;  %v3937_v3 = vld [vmem:[#allocation8 + $0x24] sm:$0xf] }
  0xd2   :  { %1663 = vmatpush.bf16.msra.mxu3 %v3044_v5  ;;  %v3108_v5 = vor.u32 %v3870_v54, %v3105_v56  ;;  %v1399_v12 = vpop.f32.mrf.mxu3  ;;  %v2964_v22 = vor.u32 %v3834_v6, %v2961_v9  ;;  %v3940_v54 = vld [vmem:[#allocation8 + $0x34] sm:$0xf0]  ;;  %v3443_v56 = vld [vmem:[#allocation8 + $0xb0] sm:$0xf] }
  0xd3   :  { %1690 = vmatpush.bf16.msra.mxu0 %v3284_v7  ;;  %v3936_v9 = vld [vmem:[#allocation8 + $0x14] sm:$0xf0] }
  0xd4   :  { %1652 = vmatpush.bf16.msrb.mxu1 %v2884_v21  ;;  %v357_v21 = vperm.slane %v4391_v2, 0  ;;  %v3952_v12 = vld [vmem:[#allocation8 + $0x94] sm:$0xf0] }
  0xd5   :  { %1677 = vmatpush.bf16.msra.mxu2 %v3156_v19  ;;  %v3475_v19 = vld [vmem:[#allocation8 + $0xf0] sm:$0xf] }
  0xd6   :  { %1664 = vmatpush.bf16.msra.mxu3 %v3028_v18  ;;  %v3217_v18 = vld [vmem:[#allocation5 + $0x518] sm:$0xf0]  ;;  %v3476_v28 = vor.u32 %v3964_v20, %v3475_v19  ;;  %v3413_v19 = vld [vmem:[#allocation8 + $0x78] sm:$0xf0]  ;;  %v3419_v20 = vld [vmem:[#allocation8 + $0x80] sm:$0xf] }
  0xd7   :  { %1691 = vmatpush.bf16.msra.mxu0 %v3268_v41  ;;  %v3220_v7 = vor.u32 %v3898_v17, %v3217_v18  ;;  %v1436_v34 = vpop.f32.mrf.mxu2  ;;  %v3459_v41 = vld [vmem:[#allocation8 + $0xd0] sm:$0xf]  ;;  %v3947_v17 = vld [vmem:[#allocation8 + $0x74] sm:$0xf] }
  0xd8   :  { %1653 = vmatpush.bf16.msrb.mxu1 %v2868_v36  ;;  %v3404_v36 = vor.u32 %v3946_v27, %v3403_v26  ;;  %v3460_v46 = vor.u32 %v3960_v42, %v3459_v41  ;;  %v3416_v27 = vor.u32 %v3947_v17, %v3413_v19  ;;  %v3397_v41 = vld [vmem:[#allocation8 + $0x58] sm:$0xf0]  ;;  %v3935_v17 = vld [vmem:[#allocation8 + $0x14] sm:$0xf] }
  0xd9   :  { %1678 = vmatpush.bf16.msra.mxu2 %v3140_v33  ;;  %v1359_v33 = vadd.f32 %v4383_v16, %v357_v21  ;;  %v3387_v16 = vld [vmem:[#allocation8 + $0x40] sm:$0xf]  ;;  %v3950_v21 = vld [vmem:[#allocation8 + $0x84] sm:$0xf0]  ;;  %v3951_v19 = vld [vmem:[#allocation8 + $0x94] sm:$0xf] }
  0xda   :  { %1665 = vmatpush.bf16.msra.mxu3 %v3012_v32  ;;  %v3962_v32 = vld [vmem:[#allocation8 + $0xe4] sm:$0xf0]  ;;  %v3388_v53 = vor.u32 %v3942_v44, %v3387_v16  ;;  %v3941_v44 = vld [vmem:[#allocation8 + $0x44] sm:$0xf] }
  0xdb   :  { %1692 = vmatpush.bf16.msra.mxu0 %v3252_v58  ;;  %v3468_v40 = vor.u32 %v3962_v32, %v3467_v29  ;;  %v1372_v43 = vadd.f32 %v4385_v25, %v1359_v33  ;;  %v3379_v25 = vld [vmem:[#allocation8 + $0x30] sm:$0xf]  ;;  %v3945_v29 = vld [vmem:[#allocation8 + $0x64] sm:$0xf]  ;;  %v3405_v32 = vld [vmem:[#allocation8 + $0x68] sm:$0xf0] }
  0xdc   :  { %1654 = vmatpush.bf16.msrb.mxu1 %v2852_v52  ;;  %v3380_v59 = vor.u32 %v3940_v54, %v3379_v25  ;;  %v3531_v25 = vld [vmem:[#allocation8 + $0x160] sm:$0xf]  ;;  %v3978_v54 = vld [vmem:[#allocation8 + $0x164] sm:$0xf0] }
  0xdd   :  { %1679 = vmatpush.bf16.msra.mxu2 %v3124_v49  ;;  %v3958_v49 = vld [vmem:[#allocation8 + $0xc4] sm:$0xf0]  ;;  %v1385_v50 = vadd.f32 %v4387_v31, %v1372_v43  ;;  %v3959_v43 = vld [vmem:[#allocation8 + $0xd4] sm:$0xf] }
  0xde   :  { %1666 = vmatpush.bf16.msra.mxu3 %v2996_v48  ;;  %v3451_v48 = vld [vmem:[#allocation8 + $0xc0] sm:$0xf] }
  0xdf   :  { %1693 = vmatpush.bf16.msra.mxu0 %v3236_v13  ;;  %v1410_v47 = vpop.f32.mrf.mxu0  ;;  %v1438_v52 = vpop.f32.mrf.mxu2  ;;  %v1398_v58 = vadd.f32 %v4389_v37, %v1385_v50  ;;  %v3539_v50 = vld [vmem:[#allocation8 + $0x170] sm:$0xf] }
  0xe0   :  { %1655 = vmatpush.bf16.msrb.mxu1 %v2836_v8  ;;  %v3363_v8 = vld [vmem:[#allocation8 + $0x10] sm:$0xf] }
  0xe1   :  { %1680 = vmatpush.bf16.msra.mxu2 %v3108_v5  ;;  %v1411_v60 = vadd.f32 %v1410_v47, %v1398_v58  ;;  %v3372_v5 = vor.u32 %v3938_v62, %v3371_v61  ;;  %v3364_v13 = vor.u32 %v3936_v9, %v3363_v8  ;;  %v3939_v58 = vld [vmem:[#allocation8 + $0x34] sm:$0xf]  ;;  %v3532_v61 = vor.u32 %v3978_v54, %v3531_v25  ;;  %v3437_v9 = vld [vmem:[#allocation8 + $0xa8] sm:$0xf0]  ;;  %v3966_v25 = vld [vmem:[#allocation8 + $0x104] sm:$0xf0] }
  0xe2   :  { %1667 = vmatpush.bf16.msra.mxu3 %v2980_v4  ;;  %v3955_v62 = vld [vmem:[#allocation8 + $0xb4] sm:$0xf] }
  0xe3   :  { %1656 = vmatmul.bf16.vlgmr.msrb.gmra.mxu1 %v4343_v51  ;;  %1694 = vmatpush.bf16.msra.mxu0 %v3220_v7  ;;  %v3396_v51 = vor.u32 %v3944_v39, %v3395_v38  ;;  %v3408_v39 = vor.u32 %v3945_v29, %v3405_v32  ;;  %v3949_v29 = vld [vmem:[#allocation8 + $0x84] sm:$0xf]  ;;  %v3972_v32 = vld [vmem:[#allocation8 + $0x134] sm:$0xf0] }
  0xe4   :  { %1707 = vmatpush.bf16.msra.mxu1 %v3348_v14 }
  0xe5   :  { %1681 = vmatpush.bf16.msra.mxu2 %v3092_v23  ;;  %v3477_v23 = vld [vmem:[#allocation8 + $0xf8] sm:$0xf0] }
  0xe6   :  { %1668 = vmatpush.bf16.msra.mxu3 %v2964_v22  ;;  %1695 = vmatmul.bf16.vlgmr.msra.gmra.mxu0 %v4361_v35  ;;  %v3956_v35 = vld [vmem:[#allocation8 + $0xb4] sm:$0xf0]  ;;  %v3963_v22 = vld [vmem:[#allocation8 + $0xf4] sm:$0xf] }
  0xe7   :  { %v3444_v63 = vor.u32 %v3956_v35, %v3443_v56  ;;  %v1412_v0 = vpop.f32.mrf.mxu0  ;;  %v3480_v33 = vor.u32 %v3963_v22, %v3477_v23  ;;  %v358_v56 = vperm.slane %v4391_v2, 1  ;;  %v3974_v22 = vld [vmem:[#allocation8 + $0x144] sm:$0xf0] }
  0xe8   :  { %2124 = vmatpush.bf16.msrb.mxu1 %v3476_v28  ;;  %1682 = vmatmul.bf16.vlgmr.msra.gmra.mxu2 %v4359_v30  ;;  %v3452_v30 = vor.u32 %v3958_v49, %v3451_v48  ;;  %v4402_v31 = vpop.f32.mrf.mxu3  ;;  %v3420_v28 = vor.u32 %v3950_v21, %v3419_v20  ;;  %v3957_v48 = vld [vmem:[#allocation8 + $0xc4] sm:$0xf]  ;;  %v3453_v49 = vld [vmem:[#allocation8 + $0xc8] sm:$0xf0]  ;;  %v3429_v20 = vld [vmem:[#allocation8 + $0x98] sm:$0xf0] }
  0xe9   :  { %1669 = vmatmul.bf16.vlgmr.msra.gmra.mxu3 %v4347_v57  ;;  %v1423_v57 = vpop.f32.mrf.mxu1  ;;  %v1450_v1 = vadd.f32 %v4402_v31, %v358_v56  ;;  %v3515_v21 = vld [vmem:[#allocation8 + $0x140] sm:$0xf]  ;;  %v3979_v56 = vld [vmem:[#allocation8 + $0x174] sm:$0xf] }
  0xea   :  { %2111 = vmatpush.bf16.msrb.mxu3 %v3412_v24  ;;  %v1424_v37 = vadd.f32 %v1423_v57, %v1411_v60  ;;  %v3356_v24 = vor.u32 %v3934_v55, %v3355_v15  ;;  %v3980_v57 = vld [vmem:[#allocation8 + $0x174] sm:$0xf0]  ;;  %v3456_v60 = vor.u32 %v3957_v48, %v3453_v49 }
  0xeb   :  { %v4406_v6 = vpop.f32.mrf.mxu2 }
  0xec   :  { %2125 = vmatpush.bf16.msrb.mxu1 %v3468_v40  ;;  %v1437_v14 = vadd.f32 %v1436_v34, %v1424_v37  ;;  %v3961_v34 = vld [vmem:[#allocation8 + $0xe4] sm:$0xf]  ;;  %v3943_v40 = vld [vmem:[#allocation8 + $0x54] sm:$0xf]  ;;  %v1463_v55 = vadd.f32 %v4406_v6, %v1450_v1  ;;  %v3507_v6 = vld [vmem:[#allocation8 + $0x130] sm:$0xf] }
  0xed   :  { %v3400_v16 = vor.u32 %v3943_v40, %v3397_v41  ;;  %v3953_v37 = vld [vmem:[#allocation8 + $0xa4] sm:$0xf]  ;;  %v3970_v40 = vld [vmem:[#allocation8 + $0x124] sm:$0xf0] }
  0xee   :  { %2112 = vmatpush.bf16.msrb.mxu3 %v3404_v36  ;;  %v1713_v26 = vmax.f32 %v1437_v14, 0.0  ;;  %v3469_v36 = vld [vmem:[#allocation8 + $0xe8] sm:$0xf0] }
  0xef   :  { %v3472_v42 = vor.u32 %v3961_v34, %v3469_v36  ;;  %v3421_v34 = vld [vmem:[#allocation8 + $0x88] sm:$0xf0]  ;;  %v3508_v36 = vor.u32 %v3972_v32, %v3507_v6 }
  0xf0   :  { %2126 = vmatpush.bf16.msrb.mxu1 %v3460_v46  ;;  %v1451_v18 = vpop.f32.mrf.mxu3  ;;  %v4408_v38 = vpack.c.bf16 %v1713_v26, %v1713_v26  ;;  %v3389_v46 = vld [vmem:[#allocation8 + $0x48] sm:$0xf0]  ;;  %v3933_v26 = vld [vmem:[#allocation8 + $0x4] sm:$0xf] }
  0xf1   :  { %v1425_v4 = vpop.f32.mrf.mxu1  ;;  %v3440_v18 = vor.u32 %v3953_v37, %v3437_v9  ;;  %v3994_v9 = vld [vmem:[#allocation8 + $0x1e4] sm:$0xf0] }
  0xf2   :  { %2113 = vmatpush.bf16.msrb.mxu3 %v3396_v51  ;;  %v3461_v51 = vld [vmem:[#allocation8 + $0xd8] sm:$0xf0]  ;;  %v3373_v4 = vld [vmem:[#allocation8 + $0x28] sm:$0xf0] }
  0xf3   :  { %3352 = vmatmul.msk.bf16.vlgmr.msra.gmra.mxu1 %vm1345_vm0, %v4355_v45  ;;  %v3428_v45 = vor.u32 %v3952_v12, %v3427_v11  ;;  %v1464_v7 = vpop.f32.mrf.mxu2  ;;  %v3464_v47 = vor.u32 %v3959_v43, %v3461_v51  ;;  %v3976_v11 = vld [vmem:[#allocation8 + $0x154] sm:$0xf0]  ;;  %v3376_v15 = vor.u32 %v3937_v3, %v3373_v4  ;;  %v3975_v4 = vld [vmem:[#allocation8 + $0x154] sm:$0xf] }
  0xf4   :  { %2127 = vmatpush.bf16.msrb.mxu1 %v3452_v30  ;;  %v3392_v30 = vor.u32 %v3941_v44, %v3389_v46  ;;  %v3491_v46 = vld [vmem:[#allocation8 + $0x110] sm:$0xf] }
  0xf6   :  { %2114 = vmatpush.bf16.msrb.mxu3 %v3388_v53  ;;  %v3540_v53 = vor.u32 %v3980_v57, %v3539_v50 }
  0xf8   :  { %2128 = vmatpush.bf16.msrb.mxu1 %v3444_v63  ;;  %2137 = vmatpush.bf16.msrb.mxu2 %v3540_v53  ;;  %v3445_v63 = vld [vmem:[#allocation8 + $0xb8] sm:$0xf0]  ;;  %v3483_v53 = vld [vmem:[#allocation8 + $0x100] sm:$0xf] }
  0xfa   :  { %2115 = vmatpush.bf16.msrb.mxu3 %v3380_v59  ;;  %v3381_v59 = vld [vmem:[#allocation8 + $0x38] sm:$0xf0] }
  0xfb   :  { %v3384_v0 = vor.u32 %v3939_v58, %v3381_v59  ;;  %v3977_v58 = vld [vmem:[#allocation8 + $0x164] sm:$0xf] }
  0xfc   :  { %2129 = vmatpush.bf16.msrb.mxu1 %v3436_v10  ;;  %2138 = vmatpush.bf16.msrb.mxu2 %v3532_v61  ;;  %v3523_v10 = vld [vmem:[#allocation8 + $0x150] sm:$0xf] }
  0xfd   :  { %v3603_v61 = vld [vmem:[#allocation8 + $0x1f0] sm:$0xf] }
  0xfe   :  { %2116 = vmatpush.bf16.msrb.mxu3 %v3372_v5  ;;  %v3448_v5 = vor.u32 %v3955_v62, %v3445_v63  ;;  %v3996_v62 = vld [vmem:[#allocation8 + $0x1f4] sm:$0xf0] }
  0xff   :  { %v1475_v52 = vpop.f32.mrf.mxu0  ;;  %v3604_v63 = vor.u32 %v3996_v62, %v3603_v61  ;;  %v3993_v62 = vld [vmem:[#allocation8 + $0x1e4] sm:$0xf] }
 0x100   :  { %2130 = vmatpush.bf16.msrb.mxu1 %v3428_v45  ;;  %v1488_v35 = vpop.f32.mrf.mxu1  ;;  %v3365_v45 = vld [vmem:[#allocation8 + $0x18] sm:$0xf0]  ;;  %v1476_v23 = vadd.f32 %v1475_v52, %v1463_v55 }
 0x101   :  { %v3368_v7 = vor.u32 %v3935_v17, %v3365_v45  ;;  %2150 = vmatpush.bf16.msrb.mxu0 %v3604_v63  ;;  %v3587_v45 = vld [vmem:[#allocation8 + $0x1d0] sm:$0xf]  ;;  %v3597_v63 = vld [vmem:[#allocation8 + $0x1e8] sm:$0xf0] }
 0x102   :  { %2117 = vmatpush.bf16.msrb.mxu3 %v3364_v13  ;;  %v3524_v13 = vor.u32 %v3976_v11, %v3523_v10  ;;  %v1489_v41 = vadd.f32 %v1488_v35, %v1476_v23  ;;  %v3541_v35 = vld [vmem:[#allocation8 + $0x178] sm:$0xf0]  ;;  %v3990_v23 = vld [vmem:[#allocation8 + $0x1c4] sm:$0xf0] }
 0x103   :  { %v3544_v59 = vor.u32 %v3979_v56, %v3541_v35  ;;  %v3995_v35 = vld [vmem:[#allocation8 + $0x1f4] sm:$0xf] }
 0x104   :  { %2131 = vmatpush.bf16.msrb.mxu1 %v3420_v28  ;;  %2139 = vmatpush.bf16.msrb.mxu2 %v3524_v13  ;;  %v3432_v28 = vor.u32 %v3951_v19, %v3429_v20  ;;  %v3973_v13 = vld [vmem:[#allocation8 + $0x144] sm:$0xf]  ;;  %v3971_v19 = vld [vmem:[#allocation8 + $0x134] sm:$0xf]  ;;  %v3509_v20 = vld [vmem:[#allocation8 + $0x138] sm:$0xf0] }
 0x106   :  { %2118 = vmatpush.bf16.msrb.mxu3 %v3356_v24  ;;  %v3516_v24 = vor.u32 %v3974_v22, %v3515_v21  ;;  %v3512_v21 = vor.u32 %v3971_v19, %v3509_v20  ;;  %v3579_v22 = vld [vmem:[#allocation8 + $0x1c0] sm:$0xf]  ;;  %v3985_v20 = vld [vmem:[#allocation8 + $0x1a4] sm:$0xf] }
 0x107   :  { %v1477_v12 = vpop.f32.mrf.mxu0 }
 0x108   :  { %2176 = vmatpush.bf16.msra.mxu1 %v3480_v33  ;;  %v1501_v8 = vpop.f32.mrf.mxu3  ;;  %v1490_v31 = vpop.f32.mrf.mxu1  ;;  %2140 = vmatpush.bf16.msrb.mxu2 %v3516_v24  ;;  %v3969_v24 = vld [vmem:[#allocation8 + $0x124] sm:$0xf] }
 0x109   :  { %2119 = vmatmul.bf16.vlgmr.msrb.gmra.mxu3 %v4408_v38  ;;  %v1502_v51 = vadd.f32 %v1501_v8, %v1489_v41  ;;  %v3595_v8 = vld [vmem:[#allocation8 + $0x1e0] sm:$0xf]  ;;  %v3992_v31 = vld [vmem:[#allocation8 + $0x1d4] sm:$0xf0] }
 0x10a   :  { %2163 = vmatpush.bf16.msra.mxu3 %v3416_v27  ;;  %v3357_v27 = vld [vmem:[#allocation8 + $0x8] sm:$0xf0]  ;;  %v3596_v10 = vor.u32 %v3994_v9, %v3595_v8  ;;  %v3563_v41 = vld [vmem:[#allocation8 + $0x1a0] sm:$0xf]  ;;  %v3589_v8 = vld [vmem:[#allocation8 + $0x1d8] sm:$0xf0] }
 0x10b   :  { %v1514_v14 = vpop.f32.mrf.mxu2 }
 0x10c   :  { %2177 = vmatpush.bf16.msra.mxu1 %v3472_v42  ;;  %v3360_v42 = vor.u32 %v3933_v26, %v3357_v27  ;;  %2141 = vmatpush.bf16.msrb.mxu2 %v3508_v36  ;;  %v1515_v48 = vadd.f32 %v1514_v14, %v1502_v51  ;;  %v3517_v14 = vld [vmem:[#allocation8 + $0x148] sm:$0xf0]  ;;  %v3571_v27 = vld [vmem:[#allocation8 + $0x1b0] sm:$0xf]  ;;  %v3493_v36 = vld [vmem:[#allocation8 + $0x118] sm:$0xf0] }
 0x10d   :  { %2151 = vmatpush.bf16.msrb.mxu0 %v3596_v10  ;;  %v3520_v17 = vor.u32 %v3973_v13, %v3517_v14  ;;  %v3501_v26 = vld [vmem:[#allocation8 + $0x128] sm:$0xf0]  ;;  %v3989_v13 = vld [vmem:[#allocation8 + $0x1c4] sm:$0xf] }
 0x10e   :  { %2164 = vmatpush.bf16.msra.mxu3 %v3408_v39  ;;  %v3499_v39 = vld [vmem:[#allocation8 + $0x120] sm:$0xf]  ;;  %v3504_v32 = vor.u32 %v3969_v24, %v3501_v26  ;;  %v3581_v14 = vld [vmem:[#allocation8 + $0x1c8] sm:$0xf0]  ;;  %v3557_v24 = vld [vmem:[#allocation8 + $0x198] sm:$0xf0] }
 0x10f   :  { %v3500_v44 = vor.u32 %v3970_v40, %v3499_v39  ;;  %v359_v39 = vperm.slane %v4391_v2, 2 }
 0x110   :  { %2178 = vmatpush.bf16.msra.mxu1 %v3464_v47  ;;  %v1503_v33 = vpop.f32.mrf.mxu3  ;;  %v3968_v47 = vld [vmem:[#allocation8 + $0x114] sm:$0xf0] }
 0x111   :  { %2142 = vmatpush.bf16.msrb.mxu2 %v3500_v44  ;;  %v3492_v49 = vor.u32 %v3968_v47, %v3491_v46  ;;  %v3965_v46 = vld [vmem:[#allocation8 + $0x104] sm:$0xf]  ;;  %v3485_v47 = vld [vmem:[#allocation8 + $0x108] sm:$0xf0] }
 0x112   :  { %2165 = vmatpush.bf16.msra.mxu3 %v3400_v16  ;;  %v3424_v16 = vor.u32 %v3949_v29, %v3421_v34  ;;  %v3967_v34 = vld [vmem:[#allocation8 + $0x114] sm:$0xf] }
 0x113   :  { %v1516_v43 = vpop.f32.mrf.mxu2 }
 0x114   :  { %2179 = vmatpush.bf16.msra.mxu1 %v3456_v60  ;;  %v3533_v60 = vld [vmem:[#allocation8 + $0x168] sm:$0xf0]  ;;  %v3496_v43 = vor.u32 %v3967_v34, %v3493_v36 }
 0x115   :  { %2143 = vmatpush.bf16.msrb.mxu2 %v3492_v49  ;;  %v3488_v49 = vor.u32 %v3965_v46, %v3485_v47 }
 0x116   :  { %2166 = vmatpush.bf16.msra.mxu3 %v3392_v30  ;;  %v3484_v30 = vor.u32 %v3966_v25, %v3483_v53 }
 0x118   :  { %2180 = vmatpush.bf16.msra.mxu1 %v3448_v5  ;;  %v1527_v50 = vpop.f32.mrf.mxu3  ;;  %v3525_v5 = vld [vmem:[#allocation8 + $0x158] sm:$0xf0] }
 0x119   :  { %v1528_v57 = vadd.f32 %v1527_v50, %v1515_v48  ;;  %2144 = vmatpush.bf16.msrb.mxu2 %v3484_v30  ;;  %v3528_v37 = vor.u32 %v3975_v4, %v3525_v5  ;;  %v3555_v50 = vld [vmem:[#allocation8 + $0x190] sm:$0xf]  ;;  %v3982_v30 = vld [vmem:[#allocation8 + $0x184] sm:$0xf0] }
 0x11a   :  { %2167 = vmatpush.bf16.msra.mxu3 %v3384_v0 }
 0x11b   :  { %v1714_v52 = vmax.f32 %v1528_v57, 0.0  ;;  %v3984_v57 = vld [vmem:[#allocation8 + $0x194] sm:$0xf0] }
 0x11c   :  { %2181 = vmatpush.bf16.msra.mxu1 %v3440_v18  ;;  %v3588_v18 = vor.u32 %v3992_v31, %v3587_v45  ;;  %v3987_v31 = vld [vmem:[#allocation8 + $0x1b4] sm:$0xf] }
 0x11d   :  { %v1718_v54 = vpack.c.bf16 %v1714_v52, %v1714_v52  ;;  %2189 = vmatpush.bf16.msra.mxu2 %v3544_v59  ;;  %v3556_v52 = vor.u32 %v3984_v57, %v3555_v50 }
 0x11e   :  { %2168 = vmatpush.bf16.msra.mxu3 %v3376_v15  ;;  %2152 = vmatpush.bf16.msrb.mxu0 %v3588_v18  ;;  %v3573_v18 = vld [vmem:[#allocation8 + $0x1b8] sm:$0xf0] }
 0x11f   :  { %2132 = vmatmul.bf16.vlgmr.msrb.gmra.mxu1 %v1718_v54  ;;  %v4415_v1 = vpop.f32.mrf.mxu0  ;;  %v3576_v19 = vor.u32 %v3987_v31, %v3573_v18  ;;  %v4005_v31 = vld [vmem:[#allocation10 + $0x40] sm:$0xff] }
 0x120   :  { %2182 = vmatpush.bf16.msra.mxu1 %v3432_v28  ;;  %v1529_v0 = vpop.f32.mrf.mxu3  ;;  %v1540_v3 = vpop.f32.mrf.mxu1  ;;  %v3988_v28 = vld [vmem:[#allocation8 + $0x1b4] sm:$0xf0] }
 0x121   :  { %v3572_v33 = vor.u32 %v3988_v28, %v3571_v27  ;;  %v3981_v27 = vld [vmem:[#allocation8 + $0x184] sm:$0xf]  ;;  %v3549_v28 = vld [vmem:[#allocation8 + $0x188] sm:$0xf0] }
 0x122   :  { %2169 = vmatpush.bf16.msra.mxu3 %v3368_v7  ;;  %v3580_v7 = vor.u32 %v3990_v23, %v3579_v22  ;;  %v3983_v23 = vld [vmem:[#allocation8 + $0x194] sm:$0xf] }
 0x123   :  { %v3560_v26 = vor.u32 %v3983_v23, %v3557_v24 }
 0x124   :  { %2183 = vmatpush.bf16.msra.mxu1 %v3424_v16  ;;  %2153 = vmatpush.bf16.msrb.mxu0 %v3580_v7  ;;  %v1541_v16 = vadd.f32 %v1540_v3, %v359_v39  ;;  %v3600_v3 = vor.u32 %v3993_v62, %v3597_v63  ;;  %v360_v7 = vperm.slane %v4391_v2, 3 }
 0x126   :  { %2170 = vmatpush.bf16.msra.mxu3 %v3360_v42  ;;  %v3986_v42 = vld [vmem:[#allocation8 + $0x1a4] sm:$0xf0] }
 0x127   :  { %v1568_v12 = vpop.f32.mrf.mxu0  ;;  %v3564_v51 = vor.u32 %v3986_v42, %v3563_v41 }
 0x128   :  { %v1542_v55 = vpop.f32.mrf.mxu1  ;;  %2154 = vmatpush.bf16.msrb.mxu0 %v3572_v33 }
 0x129   :  { %2171 = vmatmul.bf16.vlgmr.msra.gmra.mxu3 %v4408_v38  ;;  %v3536_v38 = vor.u32 %v3977_v58, %v3533_v60  ;;  %v3605_v58 = vld [vmem:[#allocation8 + $0x1f8] sm:$0xf0]  ;;  %v3584_v55 = vor.u32 %v3989_v13, %v3581_v14  ;;  %v4009_v13 = vld [vmem:[#allocation10 + $0x60] sm:$0xff] }
 0x12a   :  { %v3608_v59 = vor.u32 %v3995_v35, %v3605_v58 }
 0x12b   :  { %2190 = vmatpush.bf16.msra.mxu2 %v3536_v38  ;;  %v1579_v15 = vpop.f32.mrf.mxu2 }
 0x12c   :  { %v1553_v11 = vpop.f32.mrf.mxu3  ;;  %2155 = vmatpush.bf16.msrb.mxu0 %v3564_v51 }
 0x12d   :  { %v1554_v48 = vadd.f32 %v1553_v11, %v1541_v16 }
 0x12f   :  { %2191 = vmatpush.bf16.msra.mxu2 %v3528_v37  ;;  %2184 = vmatmul.bf16.vlgmr.msra.gmra.mxu1 %v1718_v54  ;;  %v1618_v6 = vpop.f32.mrf.mxu0  ;;  %v1567_v25 = vadd.f32 %v4415_v1, %v1554_v48  ;;  %v3547_v54 = vld [vmem:[#allocation8 + $0x180] sm:$0xf]  ;;  %v3991_v1 = vld [vmem:[#allocation8 + $0x1d4] sm:$0xf] }
 0x130   :  { %2156 = vmatpush.bf16.msrb.mxu0 %v3556_v52  ;;  %v3548_v56 = vor.u32 %v3982_v30, %v3547_v54  ;;  %v3592_v10 = vor.u32 %v3991_v1, %v3589_v8  ;;  %v4012_v1 = vld [vmem:[#allocation10 + $0x78] sm:$0xff]  ;;  %v3999_v8 = vld [vmem:[#allocation10 + $0x10] sm:$0xff] }
 0x131   :  { %v1580_v60 = vadd.f32 %v1579_v15, %v1567_v25  ;;  %2364 = vmatpush.bf16.msrb.mxu1 %v4012_v1 }
 0x133   :  { %2192 = vmatpush.bf16.msra.mxu2 %v3520_v17  ;;  %v1581_v40 = vpop.f32.mrf.mxu2 }
 0x134   :  { %v1555_v29 = vpop.f32.mrf.mxu3  ;;  %2157 = vmatpush.bf16.msrb.mxu0 %v3548_v56 }
 0x137   :  { %2193 = vmatpush.bf16.msra.mxu2 %v3512_v21  ;;  %v1620_v44 = vpop.f32.mrf.mxu0  ;;  %v3565_v21 = vld [vmem:[#allocation8 + $0x1a8] sm:$0xf0] }
 0x138   :  { %2202 = vmatpush.bf16.msra.mxu0 %v3608_v59  ;;  %v3568_v22 = vor.u32 %v3985_v20, %v3565_v21  ;;  %v4019_v20 = vld [vmem:[#allocation11 + $0x30] sm:$0xff] }
 0x13b   :  { %2194 = vmatpush.bf16.msra.mxu2 %v3504_v32  ;;  %v3552_v32 = vor.u32 %v3981_v27, %v3549_v28 }
 0x13c   :  { %2203 = vmatpush.bf16.msra.mxu0 %v3600_v3  ;;  %v4003_v3 = vld [vmem:[#allocation10 + $0x30] sm:$0xff] }
 0x13f   :  { %2195 = vmatpush.bf16.msra.mxu2 %v3496_v43 }
 0x140   :  { %v1592_v53 = vpop.f32.mrf.mxu1  ;;  %2204 = vmatpush.bf16.msra.mxu0 %v3592_v10  ;;  %v3998_v10 = vld [vmem:[#allocation10 + $0x8] sm:$0xff] }
 0x141   :  { %v1593_v0 = vadd.f32 %v1592_v53, %v1580_v60  ;;  %v1785_v53 = vld [vmem:[%s4439_s4] sm:$0x3] }
 0x142   :  { %v1787_v25 = vperm.slane %v1785_v53, 0  ;;  %v1788_v60 = vperm.slane %v1785_v53, 1 }
 0x143   :  { %2196 = vmatpush.bf16.msra.mxu2 %v3488_v49  ;;  %v1644_v61 = vpop.f32.mrf.mxu0 }
 0x144   :  { %2205 = vmatpush.bf16.msra.mxu0 %v3584_v55  ;;  %v4007_v55 = vld [vmem:[#allocation10 + $0x50] sm:$0xff] }
 0x148   :  { %v1594_v38 = vpop.f32.mrf.mxu1  ;;  %2206 = vmatpush.bf16.msra.mxu0 %v3576_v19  ;;  %v4020_v19 = vld [vmem:[#allocation11 + $0x38] sm:$0xff] }
 0x14b   :  { %v1631_v37 = vpop.f32.mrf.mxu2  ;;  %v1646_v12 = vpop.f32.mrf.mxu0 }
 0x14c   :  { %v1605_v4 = vpop.f32.mrf.mxu3  ;;  %2207 = vmatpush.bf16.msra.mxu0 %v3568_v22  ;;  %v1632_v29 = vadd.f32 %v1631_v37, %v360_v7  ;;  %v4000_v37 = vld [vmem:[#allocation10 + $0x18] sm:$0xff]  ;;  %v3997_v12 = vld [vmem:[#allocation10] sm:$0xff]  ;;  %v4018_v22 = vld [vmem:[#allocation11 + $0x28] sm:$0xff] }
 0x14d   :  { %v1606_v5 = vadd.f32 %v1605_v4, %v1593_v0  ;;  %v4004_v0 = vld [vmem:[#allocation10 + $0x38] sm:$0xff]  ;;  %v4002_v4 = vld [vmem:[#allocation10 + $0x28] sm:$0xff] }
 0x14e   :  { %v1645_v33 = vadd.f32 %v1644_v61, %v1632_v29  ;;  %2351 = vmatpush.bf16.msrb.mxu3 %v4004_v0  ;;  %v4045_v0 = vld [vmem:[%s4445_s10] ss:$0 sm:$0xff] }
 0x14f   :  { %v1619_v9 = vadd.f32 %v1618_v6, %v1606_v5  ;;  %v4001_v5 = vld [vmem:[#allocation10 + $0x20] sm:$0xff] }
 0x150   :  { %2208 = vmatpush.bf16.msra.mxu0 %v3560_v26  ;;  %v4017_v26 = vld [vmem:[#allocation11 + $0x20] sm:$0xff] }
 0x151   :  { %v1715_v11 = vmax.f32 %v1619_v9, 0.0  ;;  %v4011_v9 = vld [vmem:[#allocation10 + $0x70] sm:$0xff] }
 0x152   :  { %2352 = vmatpush.bf16.msrb.mxu3 %v4003_v3  ;;  %2365 = vmatpush.bf16.msrb.mxu1 %v4011_v9 }
 0x153   :  { %v1719_v15 = vpack.c.bf16 %v1715_v11, %v1715_v11  ;;  %v1633_v45 = vpop.f32.mrf.mxu2  ;;  %v4010_v11 = vld [vmem:[#allocation10 + $0x68] sm:$0xff] }
 0x154   :  { %v1607_v17 = vpop.f32.mrf.mxu3  ;;  %2209 = vmatpush.bf16.msra.mxu0 %v3552_v32  ;;  %v4006_v45 = vld [vmem:[#allocation10 + $0x48] sm:$0xff] }
 0x155   :  { %2145 = vmatmul.bf16.vlgmr.msrb.gmra.mxu2 %v1719_v15 }
 0x156   :  { %2353 = vmatpush.bf16.msrb.mxu3 %v4002_v4  ;;  %2366 = vmatpush.bf16.msrb.mxu1 %v4010_v11 }
 0x157   :  { %2447 = vmatpush.bf16.msrb.mxu2 %v4020_v19 }
 0x15a   :  { %2354 = vmatpush.bf16.msrb.mxu3 %v4001_v5  ;;  %2367 = vmatpush.bf16.msrb.mxu1 %v4009_v13 }
 0x15b   :  { %2448 = vmatpush.bf16.msrb.mxu2 %v4019_v20 }
 0x15e   :  { %2355 = vmatpush.bf16.msrb.mxu3 %v4000_v37 }
 0x15f   :  { %2449 = vmatpush.bf16.msrb.mxu2 %v4018_v22 }
 0x160   :  { %v1657_v6 = vpop.f32.mrf.mxu1 }
 0x161   :  { %v1658_v36 = vadd.f32 %v1657_v6, %v1645_v33 }
 0x162   :  { %2356 = vmatpush.bf16.msrb.mxu3 %v3999_v8 }
 0x163   :  { %v1696_v34 = vpop.f32.mrf.mxu0  ;;  %2450 = vmatpush.bf16.msrb.mxu2 %v4017_v26 }
 0x165   :  { %2197 = vmatmul.bf16.vlgmr.msra.gmra.mxu2 %v1719_v15  ;;  %v4008_v15 = vld [vmem:[#allocation10 + $0x58] sm:$0xff] }
 0x166   :  { %2357 = vmatpush.bf16.msrb.mxu3 %v3998_v10  ;;  %2368 = vmatpush.bf16.msrb.mxu1 %v4008_v15 }
 0x168   :  { %v1659_v39 = vpop.f32.mrf.mxu1 }
 0x16a   :  { %2358 = vmatpush.bf16.msrb.mxu3 %v3997_v12  ;;  %2369 = vmatpush.bf16.msrb.mxu1 %v4007_v55 }
 0x16b   :  { %v1683_v42 = vpop.f32.mrf.mxu2  ;;  %v1698_v51 = vpop.f32.mrf.mxu0 }
 0x16c   :  { %v1670_v40 = vpop.f32.mrf.mxu3  ;;  %v4028_v51 = vld [vmem:[#allocation13 + $0x38] sm:$0xff] }
 0x16d   :  { %v1671_v41 = vadd.f32 %v1670_v40, %v1658_v36  ;;  %v4016_v40 = vld [vmem:[#allocation11 + $0x18] sm:$0xff] }
 0x16e   :  { %2370 = vmatpush.bf16.msrb.mxu1 %v4006_v45  ;;  %2451 = vmatpush.bf16.msrb.mxu2 %v4016_v40 }
 0x16f   :  { %v1684_v43 = vadd.f32 %v1683_v42, %v1671_v41  ;;  %v4015_v41 = vld [vmem:[#allocation11 + $0x10] sm:$0xff]  ;;  %v4014_v42 = vld [vmem:[#allocation11 + $0x8] sm:$0xff] }
 0x170   :  { %v1709_v16 = vpop.f32.mrf.mxu1 }
 0x171   :  { %v1697_v2 = vadd.f32 %v1696_v34, %v1684_v43  ;;  %v4013_v43 = vld [vmem:[#allocation11] sm:$0xff] }
 0x172   :  { %2371 = vmatpush.bf16.msrb.mxu1 %v4005_v31  ;;  %2452 = vmatpush.bf16.msrb.mxu2 %v4015_v41 }
 0x173   :  { %v1710_v44 = vadd.f32 %v1709_v16, %v1697_v2  ;;  %v1685_v47 = vpop.f32.mrf.mxu2  ;;  %v4027_v2 = vld [vmem:[#allocation13 + $0x30] sm:$0xff]  ;;  %v4026_v16 = vld [vmem:[#allocation13 + $0x28] sm:$0xff] }
 0x174   :  { %v1672_v46 = vpop.f32.mrf.mxu3  ;;  %v4024_v47 = vld [vmem:[#allocation13 + $0x18] sm:$0xff] }
 0x175   :  { %v1716_v48 = vmax.f32 %v1710_v44, 0.0  ;;  %v4025_v44 = vld [vmem:[#allocation13 + $0x20] sm:$0xff] }
 0x176   :  { %2453 = vmatpush.bf16.msrb.mxu2 %v4014_v42 }
 0x177   :  { %v1720_v49 = vpack.c.bf16 %v1716_v48, %v1716_v48  ;;  %v4023_v48 = vld [vmem:[#allocation13 + $0x10] sm:$0xff] }
 0x178   :  { %v1711_v50 = vpop.f32.mrf.mxu1 }
 0x179   :  { %2158 = vmatmul.bf16.vlgmr.msrb.gmra.mxu0 %v1720_v49 }
 0x17a   :  { %2454 = vmatpush.bf16.msrb.mxu2 %v4013_v43  ;;  %2530 = vmatpush.bf16.msrb.mxu0 %v4028_v51 }
 0x17e   :  { %2531 = vmatpush.bf16.msrb.mxu0 %v4027_v2 }
 0x182   :  { %2532 = vmatpush.bf16.msrb.mxu0 %v4026_v16 }
 0x186   :  { %2533 = vmatpush.bf16.msrb.mxu0 %v4025_v44 }
 0x189   :  { %2210 = vmatmul.bf16.vlgmr.msra.gmra.mxu0 %v1720_v49  ;;  %v4043_v49 = vld [vmem:[%s4441_s6] ss:$0 sm:$0xff] }
 0x18a   :  { %2534 = vmatpush.bf16.msrb.mxu0 %v4024_v47 }
 0x18c   :  { %v2120_v57 = vpop.f32.mrf.mxu3 }
 0x18d   :  { %v2121_v54 = vadd.f32 %v2120_v57, %v1787_v25 }
 0x18e   :  { %2535 = vmatpush.bf16.msrb.mxu0 %v4023_v48 }
 0x194   :  { %v2122_v52 = vpop.f32.mrf.mxu3 }
 0x19c   :  { %v2133_v30 = vpop.f32.mrf.mxu1 }
 0x19d   :  { %v2134_v35 = vadd.f32 %v2133_v30, %v2121_v54 }
 0x1a4   :  { %v2135_v58 = vpop.f32.mrf.mxu1 }
 0x1a5   :  { %v4044_v58 = vld [vmem:[%s4443_s8] ss:$0 sm:$0xff] }
 0x1ac   :  { %v2172_v56 = vpop.f32.mrf.mxu3  ;;  %v2185_v62 = vpop.f32.mrf.mxu1 }
 0x1ad   :  { %v2173_v61 = vadd.f32 %v2172_v56, %v1788_v60  ;;  %v4022_v56 = vld [vmem:[#allocation13 + $0x8] sm:$0xff] }
 0x1ae   :  { %2536 = vmatpush.bf16.msrb.mxu0 %v4022_v56 }
 0x1af   :  { %v2186_v63 = vadd.f32 %v2185_v62, %v2173_v61 }
 0x1b4   :  { %v2174_v59 = vpop.f32.mrf.mxu3  ;;  %v2187_v38 = vpop.f32.mrf.mxu1 }
 0x1d8   :  { %v2146_v14 = vpop.f32.mrf.mxu2 }
 0x1d9   :  { %v2147_v23 = vadd.f32 %v2146_v14, %v2134_v35  ;;  %v4021_v35 = vld [vmem:[#allocation13] sm:$0xff] }
 0x1da   :  { %2537 = vmatpush.bf16.msrb.mxu0 %v4021_v35 }
 0x1e0   :  { %v2148_v17 = vpop.f32.mrf.mxu2 }
 0x1e8   :  { %v2198_v18 = vpop.f32.mrf.mxu2 }
 0x1e9   :  { %v2199_v6 = vadd.f32 %v2198_v18, %v2186_v63 }
 0x1f0   :  { %v2200_v21 = vpop.f32.mrf.mxu2 }
 0x1f6   :  { %v2159_v24 = vpop.f32.mrf.mxu0 }
 0x1f7   :  { %v2160_v7 = vadd.f32 %v2159_v24, %v2147_v23 }
 0x1f9   :  { %v2215_v27 = vmax.f32 %v2160_v7, 0.0 }
 0x1fb   :  { %v2217_v28 = vpack.c.bf16 %v2215_v27, %v2215_v27 }
 0x1fd   :  { %2359 = vmatmul.bf16.vlgmr.msrb.gmra.mxu3 %v2217_v28 }
 0x1fe   :  { %v2161_v29 = vpop.f32.mrf.mxu0 }
 0x206   :  { %v2211_v32 = vpop.f32.mrf.mxu0 }
 0x207   :  { %v2212_v33 = vadd.f32 %v2211_v32, %v2199_v6 }
 0x209   :  { %v2216_v34 = vmax.f32 %v2212_v33, 0.0 }
 0x20b   :  { %v2218_v36 = vpack.c.bf16 %v2216_v34, %v2216_v34 }
 0x20d   :  { %2372 = vmatmul.bf16.vlgmr.msrb.gmra.mxu1 %v2218_v36 }
 0x20e   :  { %v2213_v39 = vpop.f32.mrf.mxu0 }
 0x280   :  { %v2360_v46 = vpop.f32.mrf.mxu3 }
 0x281   :  { %v2361_v57 = vadd.f32 %v4043_v49, %v2360_v46 }
 0x288   :  { %v2362_v50 = vpop.f32.mrf.mxu3 }
 0x28a   :  { %v2373_v52 = vpop.f32.mrf.mxu1 }
 0x28b   :  { %v2374_v53 = vadd.f32 %v2373_v52, %v2361_v57 }
 0x28d   :  { %v2377_v25 = vmax.f32 %v2374_v53, 0.0 }
 0x28f   :  { %v2378_v54 = vpack.c.bf16 %v2377_v25, %v2377_v25 }
 0x291   :  { %2455 = vmatmul.bf16.vlgmr.msrb.gmra.mxu2 %v2378_v54 }
 0x292   :  { %v2375_v30 = vpop.f32.mrf.mxu1 }
 0x314   :  { %v2456_v59 = vpop.f32.mrf.mxu2 }
 0x315   :  { %v2457_v60 = vadd.f32 %v4044_v58, %v2456_v59 }
 0x317   :  { %v2460_v61 = vmax.f32 %v2457_v60, 0.0 }
 0x319   :  { %v2461_v62 = vpack.c.bf16 %v2460_v61, %v2460_v61 }
 0x31b   :  { %2538 = vmatmul.bf16.vlgmr.msrb.gmra.mxu0 %v2461_v62 }
 0x31c   :  { %v2458_v63 = vpop.f32.mrf.mxu2 }
 0x398   :  { %v2539_v38 = vpop.f32.mrf.mxu0 }
 0x399   :  { %v2540_v3 = vadd.f32 %v4045_v0, %v2539_v38 }
 0x39b   :  { %v2543_v4 = vpack.c.bf16 %v2540_v3, %v2540_v3 }
 0x39d   :  { %2544 = vst [vmem:[#allocation14] sm:$0xf] %v2543_v4 }
 0x39e   :  { %2555 = dma.vmem_to_hbm [thread:$0]  %s2551_s18, 64, %s2553_s21, [#allocation4]  }
 0x3a0   :  { %v2541_v5 = vpop.f32.mrf.mxu0 }
 0x3a1   :  { %4246 = dma.done.wait [#allocation4], 64  }
 0x3a2   :  { %4247 = vsyncadd [#allocation4], 4294967232 }
 0x3a3   :  { %2560 = vsyncpa [#allocation3], 1 }
 0x3a4   :  { %2561 = vsyncpa [#allocation6], 1 }
 0x3a5   :  { %2562 = vsyncpa [#allocation9], 1 }
 0x3a6   :  { %2563 = vsyncpa [#allocation12], 1 }
 0x3a7   :  { %2564 = vsyncpa [#allocation4], 1 }

</bundles_post_ra>
